<compile_context>
chip_gen: v7x
topology: tpu7x:2x2x1
jax: 0.10.0
libtpu: 0.0.40
codegen_flags: <defaults>
</compile_context>

<pallas_src>
from math import sqrt

import jax
import jax.numpy as jnp
from jax.experimental import pallas as pl
from jax.experimental.pallas import tpu as pltpu


# ----------------------------------------------------------------------------
# Fused kernel: one (batch, row-tile) grid step.
# ----------------------------------------------------------------------------
def _make_net_kernel(H, W, C1, C2, TH):
    def kernel(x_ref, w1_ref, b1_ref, w2_ref, b2_ref, w3_ref, b3_ref,
               o_ref, a1s_ref):
        # Per grid step (batch n, row tile r):
        #   x_ref : (1, 1, H+4, W+2)  zero-padded image (2-row / 1-col halo);
        #                             same block for every r (stays resident)
        #   w1_ref: (9, C1, 1)        layer-1 taps, leading index t = dy*3+dx
        #   b1_ref: (1, C1, 1)
        #   w2_ref: (C2, 9*C1)        layer-2 im2col weights, col = t*C1 + ci
        #   b2_ref: (C2, 1)
        #   w3_ref: (C2, 1)           1x1 head weights
        #   b3_ref: (1, 1)
        #   o_ref : (1, 1, TH, W)     sigmoid mask rows [r*TH, r*TH + TH)
        #   a1s_ref: (TH+2, C1, W+2)  VMEM scratch: layer-1 activations for the
        #                             tile + 1-row halo, zero-padded columns.
        r = pl.program_id(1)
        r0 = pl.multiple_of(r * TH, TH)

        # ---- layer 1: 3x3 conv (1 -> C1) + ReLU on the VPU (Cin = 1, so the
        #      contraction is one broadcast FMA per tap).  Evaluated on TH+2
        #      rows (tile + 1-row halo for layer 2).  Each input row slab is
        #      loaded once per dy and consumed immediately. ----
        w1 = w1_ref[...]                                       # (9, C1, 1)
        acc1 = jnp.zeros((TH + 2, C1, W), jnp.float32)
        for dy in range(3):
            rows = x_ref[0, 0, pl.ds(r0 + dy, TH + 2), :]      # (TH+2, W+2)
            rows = rows[:, None, :].astype(jnp.float32)        # (TH+2, 1, W+2)
            for dx in range(3):
                acc1 = acc1 + w1[dy * 3 + dx] * rows[:, :, dx:dx + W]
        a1 = jnp.maximum(acc1 + b1_ref[...], 0.0)              # (TH+2, C1, W)

        # Stage into VMEM with zero-padded columns: layer-2's left/right zero
        # padding is carried by the data (no masks, no rolls).
        zc = jnp.zeros((TH + 2, C1, 1), jnp.float32)
        a1s_ref[...] = jnp.concatenate([zc, a1, zc], axis=2)   # (TH+2,C1,W+2)

        # Layer-2's top/bottom zero padding: only the first/last row tile has
        # an out-of-image halo row, so gate the zeroing instead of masking.
        @pl.when(r == 0)
        def _():
            a1s_ref[0] = jnp.zeros((C1, W + 2), jnp.float32)

        @pl.when(r == pl.num_programs(1) - 1)
        def _():
            a1s_ref[TH + 1] = jnp.zeros((C1, W + 2), jnp.float32)

        # ---- layer 2 + head, one output row at a time on the MXU:
        #      (C2, 9*C1) x (9*C1, W) matmul whose RHS is assembled straight
        #      from scratch slices (no (72, H*W) patch-matrix round trip),
        #      then the 1x1 head as a sublane reduce and sigmoid on the EUP.
        w2 = w2_ref[...]                                       # (C2, 9*C1)
        b2 = b2_ref[...]                                       # (C2, 1)
        w3 = w3_ref[...]                                       # (C2, 1)
        b3 = b3_ref[...]                                       # (1, 1)

        def row_body(yy, carry):
            rows3 = [a1s_ref[yy + dy] for dy in range(3)]      # 3 x (C1, W+2)
            patch = jnp.concatenate(
                [rows3[dy][:, dx:dx + W]
                 for dy in range(3) for dx in range(3)], axis=0)   # (9*C1, W)
            a2 = jnp.dot(w2, patch, preferred_element_type=jnp.float32) + b2
            a2 = jnp.maximum(a2, 0.0)                          # (C2, W)
            logit = jnp.sum(w3 * a2, axis=0, keepdims=True) + b3   # (1, W)
            o_ref[0, 0, pl.ds(yy, 1), :] = jax.nn.sigmoid(logit)
            return carry

        jax.lax.fori_loop(0, TH, row_body, 0, unroll=(TH <= 16))

    return kernel


# ----------------------------------------------------------------------------
# Wrapper ("Net" equivalent forward)
# ----------------------------------------------------------------------------
def net_forward(params, img_nchw, *, row_tile=8):
    """Equivalent of Net.forward(img): NCHW (Cin=1) image -> NCHW sigmoid mask."""
    N, Cin, H, W = img_nchw.shape
    assert Cin == 1, "single-channel infrared input expected"
    C1 = params["w1"].shape[-1]
    C2 = params["w2"].shape[-1]

    # Row-tile height: a divisor of H (fall back to whole image).  At real
    # IRSTD sizes pick a multiple of 8 that keeps the scratch within VMEM.
    TH = row_tile if (row_tile is not None and H % row_tile == 0) else H
    R = H // TH

    # Zero-pad once outside the kernel (tiny XLA op): 2 rows top/bottom so
    # layer 1 can be evaluated on layer-2's 1-row halo, 1 column left/right
    # for the dx taps.  All in-kernel taps become plain slices.
    xpad = jnp.pad(img_nchw.astype(jnp.float32),
                   ((0, 0), (0, 0), (2, 2), (1, 1)))           # (N,1,H+4,W+2)

    # Weight re-layouts (tiny, once per call, outside the hot path):
    #   w1 HWIO (3,3,1,C1)  -> (9, C1, 1)     leading index t = dy*3 + dx
    #   w2 HWIO (3,3,C1,C2) -> (C2, 9*C1)     column = (dy*3 + dx)*C1 + ci
    w1m = params["w1"][:, :, 0, :].reshape(9, C1)[:, :, None]
    w2m = jnp.transpose(params["w2"], (3, 0, 1, 2)).reshape(C2, 9 * C1)
    b1 = params["b1"].reshape(1, C1, 1)
    b2 = params["b2"].reshape(C2, 1)
    w3 = params["w3"].reshape(C2, 1)
    b3 = params["b3"].reshape(1, 1)

    kernel = _make_net_kernel(H, W, C1, C2, TH)

    # Explicit scoped-VMEM budget: double-buffered in/out blocks + scratch +
    # weights + compiler headroom (well under 64 MiB physical on v7x).
    blk_in = (H + 4) * (W + 2) * 4
    blk_out = TH * W * 4
    scratch = (TH + 2) * C1 * (W + 2) * 4
    wts = (9 * C1 + C1 + C2 * 9 * C1 + 2 * C2 + 1) * 4
    vmem_bytes = int(2 * (blk_in + blk_out + wts) + scratch + (8 << 20))

    out = pl.pallas_call(
        kernel,
        out_shape=jax.ShapeDtypeStruct((N, 1, H, W), jnp.float32),
        grid=(N, R),
        in_specs=[
            pl.BlockSpec((1, 1, H + 4, W + 2), lambda n, r: (n, 0, 0, 0)),
            pl.BlockSpec((9, C1, 1), lambda n, r: (0, 0, 0)),      # w1
            pl.BlockSpec((1, C1, 1), lambda n, r: (0, 0, 0)),      # b1
            pl.BlockSpec((C2, 9 * C1), lambda n, r: (0, 0)),       # w2 (im2col)
            pl.BlockSpec((C2, 1), lambda n, r: (0, 0)),            # b2
            pl.BlockSpec((C2, 1), lambda n, r: (0, 0)),            # w3
            pl.BlockSpec((1, 1), lambda n, r: (0, 0)),             # b3
        ],
        out_specs=pl.BlockSpec((1, 1, TH, W), lambda n, r: (n, 0, r, 0)),
        scratch_shapes=[pltpu.VMEM((TH + 2, C1, W + 2), jnp.float32)],
        compiler_params=pltpu.CompilerParams(
            dimension_semantics=("parallel", "parallel"),
            vmem_limit_bytes=vmem_bytes),
    )(xpad, w1m, b1, w2m, b2, w3, b3)

    return out


# ----------------------------------------------------------------------------
# Parameters, reference forward (plain JAX) and loss
# ----------------------------------------------------------------------------
def init_params(key, cin=1, hidden=8):
    k1, k2, k3, k4, k5, k6 = jax.random.split(key, 6)

    def kaiming(k, shape, fan_in):
        return (jax.random.normal(k, shape, jnp.float32)
                * jnp.float32(sqrt(2.0 / fan_in)))

    return {
        "w1": kaiming(k1, (3, 3, cin, hidden), 3 * 3 * cin),
        "b1": 0.1 * jax.random.normal(k4, (hidden,), jnp.float32),
        "w2": kaiming(k2, (3, 3, hidden, hidden), 3 * 3 * hidden),
        "b2": 0.1 * jax.random.normal(k5, (hidden,), jnp.float32),
        "w3": kaiming(k3, (hidden, 1), hidden),
        "b3": 0.1 * jax.random.normal(k6, (1,), jnp.float32),
    }


def net_forward_reference(params, img_nchw):
    """Plain-JAX/XLA reference of the same forward (for correctness check)."""
    hi = jax.lax.Precision.HIGHEST
    x = jnp.transpose(img_nchw, (0, 2, 3, 1)).astype(jnp.float32)   # NHWC

    def conv3x3(x, w, b):
        N, H, W, _ = x.shape
        xp = jnp.pad(x, ((0, 0), (1, 1), (1, 1), (0, 0)))
        out = jnp.zeros((N, H, W, w.shape[-1]), jnp.float32)
        for dy in range(3):
            for dx in range(3):
                out = out + jnp.einsum("nhwc,co->nhwo",
                                       xp[:, dy:dy + H, dx:dx + W, :],
                                       w[dy, dx], precision=hi)
        return out + b

    x = jax.nn.relu(conv3x3(x, params["w1"], params["b1"]))
    x = jax.nn.relu(conv3x3(x, params["w2"], params["b2"]))
    x = jax.nn.sigmoid(
        jnp.einsum("nhwc,co->nhwo", x, params["w3"], precision=hi)
        + params["b3"])
    return jnp.transpose(x, (0, 3, 1, 2))                           # NCHW


def soft_iou_loss(pred, gt_mask, smooth=1.0):
    """SoftIoULoss equivalent of Net.loss (plain JAX glue; not the hot path)."""
    inter = jnp.sum(pred * gt_mask, axis=(1, 2, 3))
    union = (jnp.sum(pred, axis=(1, 2, 3))
             + jnp.sum(gt_mask, axis=(1, 2, 3)) - inter)
    return 1.0 - jnp.mean((inter + smooth) / (union + smooth))


# ----------------------------------------------------------------------------
if __name__ == "__main__":
    key = jax.random.PRNGKey(0)
    kp, kx, km = jax.random.split(key, 3)

    params = init_params(kp, cin=1, hidden=8)

    # Single-channel infrared image, NCHW, small shape (2 row tiles of 8).
    img = jax.random.normal(kx, (2, 1, 16, 16), jnp.float32)

    fwd = jax.jit(net_forward)
    pred = jax.block_until_ready(fwd(params, img))
    assert pred.shape == (2, 1, 16, 16)
    assert bool(jnp.all(jnp.isfinite(pred)))

    # Correctness check against the plain-JAX reference forward.
    ref = jax.block_until_ready(net_forward_reference(params, img))
    max_err = float(jnp.max(jnp.abs(pred - ref)))
    assert max_err < 2e-3, f"mismatch vs reference: max abs err {max_err}"

    # Exercise the loss too (plain JAX glue).
    gt = (jax.random.uniform(km, (2, 1, 16, 16)) > 0.9).astype(jnp.float32)
    loss = jax.block_until_ready(soft_iou_loss(pred, gt))
    assert jnp.isfinite(loss)

    print("KERNEL_OK")
</pallas_src>

<mosaic_0001>
module attributes {stable_mosaic.version = 11 : i64} {
  func.func @kernel(%arg0: i32, %arg1: i32, %arg2: memref<1x1x20x18xf32, #tpu.memory_space<vmem>>, %arg3: memref<9x8x1xf32, #tpu.memory_space<vmem>>, %arg4: memref<1x8x1xf32, #tpu.memory_space<vmem>>, %arg5: memref<8x72xf32, #tpu.memory_space<vmem>>, %arg6: memref<8x1xf32, #tpu.memory_space<vmem>>, %arg7: memref<8x1xf32, #tpu.memory_space<vmem>>, %arg8: memref<1x1xf32, #tpu.memory_space<vmem>>, %arg9: memref<1x1x8x16xf32, #tpu.memory_space<vmem>>, %arg10: memref<10x8x18xf32, #tpu.memory_space<vmem>>) attributes {dimension_semantics = [#tpu.dimension_semantics<parallel>, #tpu.dimension_semantics<parallel>], iteration_bounds = array<i64: 2, 2>, scalar_prefetch = 0 : i64, scratch_operands = 1 : i64, tpu.core_type = #tpu.core_type<tc>, window_params = [{transform_indices = @transform_0, window_bounds = array<i64: 1, 1, 20, 18>}, {pipeline_mode = #tpu.pipeline_mode<synchronous>, transform_indices = @transform_1, window_bounds = array<i64: 9, 8, 1>}, {pipeline_mode = #tpu.pipeline_mode<synchronous>, transform_indices = @transform_2, window_bounds = array<i64: 1, 8, 1>}, {pipeline_mode = #tpu.pipeline_mode<synchronous>, transform_indices = @transform_3, window_bounds = array<i64: 8, 72>}, {pipeline_mode = #tpu.pipeline_mode<synchronous>, transform_indices = @transform_4, window_bounds = array<i64: 8, 1>}, {pipeline_mode = #tpu.pipeline_mode<synchronous>, transform_indices = @transform_5, window_bounds = array<i64: 8, 1>}, {pipeline_mode = #tpu.pipeline_mode<synchronous>, transform_indices = @transform_6, window_bounds = array<i64: 1, 1>}, {transform_indices = @transform_7, window_bounds = array<i64: 1, 1, 8, 16>}]} {
    %c8_i32 = arith.constant 8 : i32
    %0 = arith.muli %arg1, %c8_i32 : i32
    %1 = tpu.assume_multiple %0, 8 : i32
    %c0 = arith.constant 0 : index
    %c0_0 = arith.constant 0 : index
    %c0_1 = arith.constant 0 : index
    %2 = vector.load %arg3[%c0, %c0_0, %c0_1] : memref<9x8x1xf32, #tpu.memory_space<vmem>>, vector<9x8x1xf32>
    %cst = arith.constant 0.000000e+00 : f32
    %3 = vector.broadcast %cst : f32 to vector<10x8x16xf32>
    %c0_i32 = arith.constant 0 : i32
    %4 = arith.addi %1, %c0_i32 : i32
    %c0_2 = arith.constant 0 : index
    %c0_3 = arith.constant 0 : index
    %5 = arith.index_cast %4 : i32 to index
    %c0_4 = arith.constant 0 : index
    %6 = vector.load %arg2[%c0_2, %c0_3, %5, %c0_4] : memref<1x1x20x18xf32, #tpu.memory_space<vmem>>, vector<1x1x10x18xf32>
    %7 = vector.shape_cast %6 : vector<1x1x10x18xf32> to vector<10x18xf32>
    %8 = vector.shape_cast %7 : vector<10x18xf32> to vector<10x1x18xf32>
    %9 = vector.extract_strided_slice %2 {offsets = [0, 0, 0], sizes = [1, 8, 1], strides = [1, 1, 1]} : vector<9x8x1xf32> to vector<1x8x1xf32>
    %10 = vector.shape_cast %9 : vector<1x8x1xf32> to vector<8x1xf32>
    %11 = vector.extract_strided_slice %8 {offsets = [0, 0, 0], sizes = [10, 1, 16], strides = [1, 1, 1]} : vector<10x1x18xf32> to vector<10x1x16xf32>
    %12 = vector.shape_cast %10 : vector<8x1xf32> to vector<1x8x1xf32>
    %13 = vector.broadcast %12 : vector<1x8x1xf32> to vector<10x8x16xf32>
    %14 = vector.broadcast %11 : vector<10x1x16xf32> to vector<10x8x16xf32>
    %15 = arith.mulf %13, %14 : vector<10x8x16xf32>
    %16 = arith.addf %3, %15 : vector<10x8x16xf32>
    %17 = vector.extract_strided_slice %2 {offsets = [1, 0, 0], sizes = [1, 8, 1], strides = [1, 1, 1]} : vector<9x8x1xf32> to vector<1x8x1xf32>
    %18 = vector.shape_cast %17 : vector<1x8x1xf32> to vector<8x1xf32>
    %19 = vector.extract_strided_slice %8 {offsets = [0, 0, 1], sizes = [10, 1, 16], strides = [1, 1, 1]} : vector<10x1x18xf32> to vector<10x1x16xf32>
    %20 = vector.shape_cast %18 : vector<8x1xf32> to vector<1x8x1xf32>
    %21 = vector.broadcast %20 : vector<1x8x1xf32> to vector<10x8x16xf32>
    %22 = vector.broadcast %19 : vector<10x1x16xf32> to vector<10x8x16xf32>
    %23 = arith.mulf %21, %22 : vector<10x8x16xf32>
    %24 = arith.addf %16, %23 : vector<10x8x16xf32>
    %25 = vector.extract_strided_slice %2 {offsets = [2, 0, 0], sizes = [1, 8, 1], strides = [1, 1, 1]} : vector<9x8x1xf32> to vector<1x8x1xf32>
    %26 = vector.shape_cast %25 : vector<1x8x1xf32> to vector<8x1xf32>
    %27 = vector.extract_strided_slice %8 {offsets = [0, 0, 2], sizes = [10, 1, 16], strides = [1, 1, 1]} : vector<10x1x18xf32> to vector<10x1x16xf32>
    %28 = vector.shape_cast %26 : vector<8x1xf32> to vector<1x8x1xf32>
    %29 = vector.broadcast %28 : vector<1x8x1xf32> to vector<10x8x16xf32>
    %30 = vector.broadcast %27 : vector<10x1x16xf32> to vector<10x8x16xf32>
    %31 = arith.mulf %29, %30 : vector<10x8x16xf32>
    %32 = arith.addf %24, %31 : vector<10x8x16xf32>
    %c1_i32 = arith.constant 1 : i32
    %33 = arith.addi %1, %c1_i32 : i32
    %c0_5 = arith.constant 0 : index
    %c0_6 = arith.constant 0 : index
    %34 = arith.index_cast %33 : i32 to index
    %c0_7 = arith.constant 0 : index
    %35 = vector.load %arg2[%c0_5, %c0_6, %34, %c0_7] : memref<1x1x20x18xf32, #tpu.memory_space<vmem>>, vector<1x1x10x18xf32>
    %36 = vector.shape_cast %35 : vector<1x1x10x18xf32> to vector<10x18xf32>
    %37 = vector.shape_cast %36 : vector<10x18xf32> to vector<10x1x18xf32>
    %38 = vector.extract_strided_slice %2 {offsets = [3, 0, 0], sizes = [1, 8, 1], strides = [1, 1, 1]} : vector<9x8x1xf32> to vector<1x8x1xf32>
    %39 = vector.shape_cast %38 : vector<1x8x1xf32> to vector<8x1xf32>
    %40 = vector.extract_strided_slice %37 {offsets = [0, 0, 0], sizes = [10, 1, 16], strides = [1, 1, 1]} : vector<10x1x18xf32> to vector<10x1x16xf32>
    %41 = vector.shape_cast %39 : vector<8x1xf32> to vector<1x8x1xf32>
    %42 = vector.broadcast %41 : vector<1x8x1xf32> to vector<10x8x16xf32>
    %43 = vector.broadcast %40 : vector<10x1x16xf32> to vector<10x8x16xf32>
    %44 = arith.mulf %42, %43 : vector<10x8x16xf32>
    %45 = arith.addf %32, %44 : vector<10x8x16xf32>
    %46 = vector.extract_strided_slice %2 {offsets = [4, 0, 0], sizes = [1, 8, 1], strides = [1, 1, 1]} : vector<9x8x1xf32> to vector<1x8x1xf32>
    %47 = vector.shape_cast %46 : vector<1x8x1xf32> to vector<8x1xf32>
    %48 = vector.extract_strided_slice %37 {offsets = [0, 0, 1], sizes = [10, 1, 16], strides = [1, 1, 1]} : vector<10x1x18xf32> to vector<10x1x16xf32>
    %49 = vector.shape_cast %47 : vector<8x1xf32> to vector<1x8x1xf32>
    %50 = vector.broadcast %49 : vector<1x8x1xf32> to vector<10x8x16xf32>
    %51 = vector.broadcast %48 : vector<10x1x16xf32> to vector<10x8x16xf32>
    %52 = arith.mulf %50, %51 : vector<10x8x16xf32>
    %53 = arith.addf %45, %52 : vector<10x8x16xf32>
    %54 = vector.extract_strided_slice %2 {offsets = [5, 0, 0], sizes = [1, 8, 1], strides = [1, 1, 1]} : vector<9x8x1xf32> to vector<1x8x1xf32>
    %55 = vector.shape_cast %54 : vector<1x8x1xf32> to vector<8x1xf32>
    %56 = vector.extract_strided_slice %37 {offsets = [0, 0, 2], sizes = [10, 1, 16], strides = [1, 1, 1]} : vector<10x1x18xf32> to vector<10x1x16xf32>
    %57 = vector.shape_cast %55 : vector<8x1xf32> to vector<1x8x1xf32>
    %58 = vector.broadcast %57 : vector<1x8x1xf32> to vector<10x8x16xf32>
    %59 = vector.broadcast %56 : vector<10x1x16xf32> to vector<10x8x16xf32>
    %60 = arith.mulf %58, %59 : vector<10x8x16xf32>
    %61 = arith.addf %53, %60 : vector<10x8x16xf32>
    %c2_i32 = arith.constant 2 : i32
    %62 = arith.addi %1, %c2_i32 : i32
    %c0_8 = arith.constant 0 : index
    %c0_9 = arith.constant 0 : index
    %63 = arith.index_cast %62 : i32 to index
    %c0_10 = arith.constant 0 : index
    %64 = vector.load %arg2[%c0_8, %c0_9, %63, %c0_10] : memref<1x1x20x18xf32, #tpu.memory_space<vmem>>, vector<1x1x10x18xf32>
    %65 = vector.shape_cast %64 : vector<1x1x10x18xf32> to vector<10x18xf32>
    %66 = vector.shape_cast %65 : vector<10x18xf32> to vector<10x1x18xf32>
    %67 = vector.extract_strided_slice %2 {offsets = [6, 0, 0], sizes = [1, 8, 1], strides = [1, 1, 1]} : vector<9x8x1xf32> to vector<1x8x1xf32>
    %68 = vector.shape_cast %67 : vector<1x8x1xf32> to vector<8x1xf32>
    %69 = vector.extract_strided_slice %66 {offsets = [0, 0, 0], sizes = [10, 1, 16], strides = [1, 1, 1]} : vector<10x1x18xf32> to vector<10x1x16xf32>
    %70 = vector.shape_cast %68 : vector<8x1xf32> to vector<1x8x1xf32>
    %71 = vector.broadcast %70 : vector<1x8x1xf32> to vector<10x8x16xf32>
    %72 = vector.broadcast %69 : vector<10x1x16xf32> to vector<10x8x16xf32>
    %73 = arith.mulf %71, %72 : vector<10x8x16xf32>
    %74 = arith.addf %61, %73 : vector<10x8x16xf32>
    %75 = vector.extract_strided_slice %2 {offsets = [7, 0, 0], sizes = [1, 8, 1], strides = [1, 1, 1]} : vector<9x8x1xf32> to vector<1x8x1xf32>
    %76 = vector.shape_cast %75 : vector<1x8x1xf32> to vector<8x1xf32>
    %77 = vector.extract_strided_slice %66 {offsets = [0, 0, 1], sizes = [10, 1, 16], strides = [1, 1, 1]} : vector<10x1x18xf32> to vector<10x1x16xf32>
    %78 = vector.shape_cast %76 : vector<8x1xf32> to vector<1x8x1xf32>
    %79 = vector.broadcast %78 : vector<1x8x1xf32> to vector<10x8x16xf32>
    %80 = vector.broadcast %77 : vector<10x1x16xf32> to vector<10x8x16xf32>
    %81 = arith.mulf %79, %80 : vector<10x8x16xf32>
    %82 = arith.addf %74, %81 : vector<10x8x16xf32>
    %83 = vector.extract_strided_slice %2 {offsets = [8, 0, 0], sizes = [1, 8, 1], strides = [1, 1, 1]} : vector<9x8x1xf32> to vector<1x8x1xf32>
    %84 = vector.shape_cast %83 : vector<1x8x1xf32> to vector<8x1xf32>
    %85 = vector.extract_strided_slice %66 {offsets = [0, 0, 2], sizes = [10, 1, 16], strides = [1, 1, 1]} : vector<10x1x18xf32> to vector<10x1x16xf32>
    %86 = vector.shape_cast %84 : vector<8x1xf32> to vector<1x8x1xf32>
    %87 = vector.broadcast %86 : vector<1x8x1xf32> to vector<10x8x16xf32>
    %88 = vector.broadcast %85 : vector<10x1x16xf32> to vector<10x8x16xf32>
    %89 = arith.mulf %87, %88 : vector<10x8x16xf32>
    %90 = arith.addf %82, %89 : vector<10x8x16xf32>
    %c0_11 = arith.constant 0 : index
    %c0_12 = arith.constant 0 : index
    %c0_13 = arith.constant 0 : index
    %91 = vector.load %arg4[%c0_11, %c0_12, %c0_13] : memref<1x8x1xf32, #tpu.memory_space<vmem>>, vector<1x8x1xf32>
    %92 = vector.broadcast %91 : vector<1x8x1xf32> to vector<10x8x16xf32>
    %93 = arith.addf %90, %92 : vector<10x8x16xf32>
    %cst_14 = arith.constant 0.000000e+00 : f32
    %94 = vector.broadcast %cst_14 : f32 to vector<10x8x16xf32>
    %95 = arith.maximumf %93, %94 : vector<10x8x16xf32>
    %cst_15 = arith.constant 0.000000e+00 : f32
    %96 = vector.broadcast %cst_15 : f32 to vector<10x8x1xf32>
    %97 = tpu.concatenate %96, %95, %96 in 2 : vector<10x8x1xf32>, vector<10x8x16xf32>, vector<10x8x1xf32> -> vector<10x8x18xf32>
    %c0_16 = arith.constant 0 : index
    %c0_17 = arith.constant 0 : index
    %c0_18 = arith.constant 0 : index
    %98 = vector.load %arg10[%c0_16, %c0_17, %c0_18] : memref<10x8x18xf32, #tpu.memory_space<vmem>>, vector<10x8x18xf32>
    tpu.vector_store %arg10[%c0_16, %c0_17, %c0_18], %97 {strides = array<i32>} : memref<10x8x18xf32, #tpu.memory_space<vmem>>, vector<10x8x18xf32>,
    %c0_i32_19 = arith.constant 0 : i32
    %99 = arith.cmpi eq, %arg1, %c0_i32_19 : i32
    %100 = arith.extui %99 : i1 to i32
    %c0_i32_20 = arith.constant 0 : i32
    %101 = arith.cmpi ne, %100, %c0_i32_20 : i32
    scf.if %101 {
      %cst_163 = arith.constant 0.000000e+00 : f32
      %445 = vector.broadcast %cst_163 : f32 to vector<8x18xf32>
      %c0_164 = arith.constant 0 : index
      %c0_165 = arith.constant 0 : index
      %c0_166 = arith.constant 0 : index
      %446 = vector.load %arg10[%c0_164, %c0_165, %c0_166] : memref<10x8x18xf32, #tpu.memory_space<vmem>>, vector<1x8x18xf32>
      %447 = vector.shape_cast %446 : vector<1x8x18xf32> to vector<8x18xf32>
      %448 = vector.shape_cast %445 : vector<8x18xf32> to vector<1x8x18xf32>
      tpu.vector_store %arg10[%c0_164, %c0_165, %c0_166], %448 {strides = array<i32>} : memref<10x8x18xf32, #tpu.memory_space<vmem>>, vector<1x8x18xf32>,
    } else {
    }
    %c1_i32_21 = arith.constant 1 : i32
    %102 = arith.cmpi eq, %arg1, %c1_i32_21 : i32
    %103 = arith.extui %102 : i1 to i32
    %c0_i32_22 = arith.constant 0 : i32
    %104 = arith.cmpi ne, %103, %c0_i32_22 : i32
    scf.if %104 {
      %cst_163 = arith.constant 0.000000e+00 : f32
      %445 = vector.broadcast %cst_163 : f32 to vector<8x18xf32>
      %c9 = arith.constant 9 : index
      %c0_164 = arith.constant 0 : index
      %c0_165 = arith.constant 0 : index
      %446 = vector.load %arg10[%c9, %c0_164, %c0_165] : memref<10x8x18xf32, #tpu.memory_space<vmem>>, vector<1x8x18xf32>
      %447 = vector.shape_cast %446 : vector<1x8x18xf32> to vector<8x18xf32>
      %448 = vector.shape_cast %445 : vector<8x18xf32> to vector<1x8x18xf32>
      tpu.vector_store %arg10[%c9, %c0_164, %c0_165], %448 {strides = array<i32>} : memref<10x8x18xf32, #tpu.memory_space<vmem>>, vector<1x8x18xf32>,
    } else {
    }
    %c0_23 = arith.constant 0 : index
    %c0_24 = arith.constant 0 : index
    %105 = vector.load %arg5[%c0_23, %c0_24] : memref<8x72xf32, #tpu.memory_space<vmem>>, vector<8x72xf32>
    %c0_25 = arith.constant 0 : index
    %c0_26 = arith.constant 0 : index
    %106 = vector.load %arg6[%c0_25, %c0_26] : memref<8x1xf32, #tpu.memory_space<vmem>>, vector<8x1xf32>
    %c0_27 = arith.constant 0 : index
    %c0_28 = arith.constant 0 : index
    %107 = vector.load %arg7[%c0_27, %c0_28] : memref<8x1xf32, #tpu.memory_space<vmem>>, vector<8x1xf32>
    %c0_29 = arith.constant 0 : index
    %c0_30 = arith.constant 0 : index
    %108 = vector.load %arg8[%c0_29, %c0_30] : memref<1x1xf32, #tpu.memory_space<vmem>>, vector<1x1xf32>
    %c0_i32_31 = arith.constant 0 : i32
    %c0_i32_32 = arith.constant 0 : i32
    %109 = arith.addi %c0_i32_31, %c0_i32_32 : i32
    %110 = arith.index_cast %109 : i32 to index
    %c0_33 = arith.constant 0 : index
    %c0_34 = arith.constant 0 : index
    %111 = vector.load %arg10[%110, %c0_33, %c0_34] : memref<10x8x18xf32, #tpu.memory_space<vmem>>, vector<1x8x18xf32>
    %112 = vector.shape_cast %111 : vector<1x8x18xf32> to vector<8x18xf32>
    %c1_i32_35 = arith.constant 1 : i32
    %113 = arith.addi %c0_i32_31, %c1_i32_35 : i32
    %114 = arith.index_cast %113 : i32 to index
    %c0_36 = arith.constant 0 : index
    %c0_37 = arith.constant 0 : index
    %115 = vector.load %arg10[%114, %c0_36, %c0_37] : memref<10x8x18xf32, #tpu.memory_space<vmem>>, vector<1x8x18xf32>
    %116 = vector.shape_cast %115 : vector<1x8x18xf32> to vector<8x18xf32>
    %c2_i32_38 = arith.constant 2 : i32
    %117 = arith.addi %c0_i32_31, %c2_i32_38 : i32
    %118 = arith.index_cast %117 : i32 to index
    %c0_39 = arith.constant 0 : index
    %c0_40 = arith.constant 0 : index
    %119 = vector.load %arg10[%118, %c0_39, %c0_40] : memref<10x8x18xf32, #tpu.memory_space<vmem>>, vector<1x8x18xf32>
    %120 = vector.shape_cast %119 : vector<1x8x18xf32> to vector<8x18xf32>
    %121 = vector.extract_strided_slice %112 {offsets = [0, 0], sizes = [8, 16], strides = [1, 1]} : vector<8x18xf32> to vector<8x16xf32>
    %122 = vector.extract_strided_slice %112 {offsets = [0, 1], sizes = [8, 16], strides = [1, 1]} : vector<8x18xf32> to vector<8x16xf32>
    %123 = vector.extract_strided_slice %112 {offsets = [0, 2], sizes = [8, 16], strides = [1, 1]} : vector<8x18xf32> to vector<8x16xf32>
    %124 = vector.extract_strided_slice %116 {offsets = [0, 0], sizes = [8, 16], strides = [1, 1]} : vector<8x18xf32> to vector<8x16xf32>
    %125 = vector.extract_strided_slice %116 {offsets = [0, 1], sizes = [8, 16], strides = [1, 1]} : vector<8x18xf32> to vector<8x16xf32>
    %126 = vector.extract_strided_slice %116 {offsets = [0, 2], sizes = [8, 16], strides = [1, 1]} : vector<8x18xf32> to vector<8x16xf32>
    %127 = vector.extract_strided_slice %120 {offsets = [0, 0], sizes = [8, 16], strides = [1, 1]} : vector<8x18xf32> to vector<8x16xf32>
    %128 = vector.extract_strided_slice %120 {offsets = [0, 1], sizes = [8, 16], strides = [1, 1]} : vector<8x18xf32> to vector<8x16xf32>
    %129 = vector.extract_strided_slice %120 {offsets = [0, 2], sizes = [8, 16], strides = [1, 1]} : vector<8x18xf32> to vector<8x16xf32>
    %130 = tpu.concatenate %121, %122, %123, %124, %125, %126, %127, %128, %129 in 0 : vector<8x16xf32>, vector<8x16xf32>, vector<8x16xf32>, vector<8x16xf32>, vector<8x16xf32>, vector<8x16xf32>, vector<8x16xf32>, vector<8x16xf32>, vector<8x16xf32> -> vector<72x16xf32>
    %cst_41 = arith.constant dense<0.000000e+00> : vector<8x16xf32>
    %131 = tpu.matmul %105, %130, %cst_41 {dimension_numbers = #tpu.dot_dimension_numbers<[1], [0], [0], [1], [0, 0, 1, 1], [], []>} : vector<8x72xf32>, vector<72x16xf32>, vector<8x16xf32> -> vector<8x16xf32>
    %132 = vector.broadcast %106 : vector<8x1xf32> to vector<8x16xf32>
    %133 = arith.addf %131, %132 : vector<8x16xf32>
    %cst_42 = arith.constant 0.000000e+00 : f32
    %134 = vector.broadcast %cst_42 : f32 to vector<8x16xf32>
    %135 = arith.maximumf %133, %134 : vector<8x16xf32>
    %136 = vector.broadcast %107 : vector<8x1xf32> to vector<8x16xf32>
    %137 = arith.mulf %136, %135 : vector<8x16xf32>
    %cst_43 = arith.constant dense<0.000000e+00> : vector<16xf32>
    %138 = vector.multi_reduction <add>, %137, %cst_43 [0] : vector<8x16xf32> to vector<16xf32>
    %139 = vector.shape_cast %138 : vector<16xf32> to vector<1x16xf32>
    %140 = vector.broadcast %108 : vector<1x1xf32> to vector<1x16xf32>
    %141 = arith.addf %139, %140 : vector<1x16xf32>
    %142 = arith.negf %141 : vector<1x16xf32>
    %143 = math.exp %142 : vector<1x16xf32>
    %cst_44 = arith.constant 1.000000e+00 : f32
    %144 = vector.broadcast %cst_44 : f32 to vector<1x16xf32>
    %145 = arith.addf %144, %143 : vector<1x16xf32>
    %146 = arith.divf %144, %145 : vector<1x16xf32>
    %c0_45 = arith.constant 0 : index
    %c0_46 = arith.constant 0 : index
    %147 = arith.index_cast %c0_i32_31 : i32 to index
    %c0_47 = arith.constant 0 : index
    %148 = vector.load %arg9[%c0_45, %c0_46, %147, %c0_47] : memref<1x1x8x16xf32, #tpu.memory_space<vmem>>, vector<1x1x1x16xf32>
    %149 = vector.shape_cast %148 : vector<1x1x1x16xf32> to vector<1x16xf32>
    %150 = vector.shape_cast %146 : vector<1x16xf32> to vector<1x1x1x16xf32>
    tpu.vector_store %arg9[%c0_45, %c0_46, %147, %c0_47], %150 {strides = array<i32>} : memref<1x1x8x16xf32, #tpu.memory_space<vmem>>, vector<1x1x1x16xf32>,
    %c1_i32_48 = arith.constant 1 : i32
    %c0_i32_49 = arith.constant 0 : i32
    %151 = arith.addi %c1_i32_48, %c0_i32_49 : i32
    %152 = arith.index_cast %151 : i32 to index
    %c0_50 = arith.constant 0 : index
    %c0_51 = arith.constant 0 : index
    %153 = vector.load %arg10[%152, %c0_50, %c0_51] : memref<10x8x18xf32, #tpu.memory_space<vmem>>, vector<1x8x18xf32>
    %154 = vector.shape_cast %153 : vector<1x8x18xf32> to vector<8x18xf32>
    %c1_i32_52 = arith.constant 1 : i32
    %155 = arith.addi %c1_i32_48, %c1_i32_52 : i32
    %156 = arith.index_cast %155 : i32 to index
    %c0_53 = arith.constant 0 : index
    %c0_54 = arith.constant 0 : index
    %157 = vector.load %arg10[%156, %c0_53, %c0_54] : memref<10x8x18xf32, #tpu.memory_space<vmem>>, vector<1x8x18xf32>
    %158 = vector.shape_cast %157 : vector<1x8x18xf32> to vector<8x18xf32>
    %c2_i32_55 = arith.constant 2 : i32
    %159 = arith.addi %c1_i32_48, %c2_i32_55 : i32
    %160 = arith.index_cast %159 : i32 to index
    %c0_56 = arith.constant 0 : index
    %c0_57 = arith.constant 0 : index
    %161 = vector.load %arg10[%160, %c0_56, %c0_57] : memref<10x8x18xf32, #tpu.memory_space<vmem>>, vector<1x8x18xf32>
    %162 = vector.shape_cast %161 : vector<1x8x18xf32> to vector<8x18xf32>
    %163 = vector.extract_strided_slice %154 {offsets = [0, 0], sizes = [8, 16], strides = [1, 1]} : vector<8x18xf32> to vector<8x16xf32>
    %164 = vector.extract_strided_slice %154 {offsets = [0, 1], sizes = [8, 16], strides = [1, 1]} : vector<8x18xf32> to vector<8x16xf32>
    %165 = vector.extract_strided_slice %154 {offsets = [0, 2], sizes = [8, 16], strides = [1, 1]} : vector<8x18xf32> to vector<8x16xf32>
    %166 = vector.extract_strided_slice %158 {offsets = [0, 0], sizes = [8, 16], strides = [1, 1]} : vector<8x18xf32> to vector<8x16xf32>
    %167 = vector.extract_strided_slice %158 {offsets = [0, 1], sizes = [8, 16], strides = [1, 1]} : vector<8x18xf32> to vector<8x16xf32>
    %168 = vector.extract_strided_slice %158 {offsets = [0, 2], sizes = [8, 16], strides = [1, 1]} : vector<8x18xf32> to vector<8x16xf32>
    %169 = vector.extract_strided_slice %162 {offsets = [0, 0], sizes = [8, 16], strides = [1, 1]} : vector<8x18xf32> to vector<8x16xf32>
    %170 = vector.extract_strided_slice %162 {offsets = [0, 1], sizes = [8, 16], strides = [1, 1]} : vector<8x18xf32> to vector<8x16xf32>
    %171 = vector.extract_strided_slice %162 {offsets = [0, 2], sizes = [8, 16], strides = [1, 1]} : vector<8x18xf32> to vector<8x16xf32>
    %172 = tpu.concatenate %163, %164, %165, %166, %167, %168, %169, %170, %171 in 0 : vector<8x16xf32>, vector<8x16xf32>, vector<8x16xf32>, vector<8x16xf32>, vector<8x16xf32>, vector<8x16xf32>, vector<8x16xf32>, vector<8x16xf32>, vector<8x16xf32> -> vector<72x16xf32>
    %cst_58 = arith.constant dense<0.000000e+00> : vector<8x16xf32>
    %173 = tpu.matmul %105, %172, %cst_58 {dimension_numbers = #tpu.dot_dimension_numbers<[1], [0], [0], [1], [0, 0, 1, 1], [], []>} : vector<8x72xf32>, vector<72x16xf32>, vector<8x16xf32> -> vector<8x16xf32>
    %174 = vector.broadcast %106 : vector<8x1xf32> to vector<8x16xf32>
    %175 = arith.addf %173, %174 : vector<8x16xf32>
    %cst_59 = arith.constant 0.000000e+00 : f32
    %176 = vector.broadcast %cst_59 : f32 to vector<8x16xf32>
    %177 = arith.maximumf %175, %176 : vector<8x16xf32>
    %178 = vector.broadcast %107 : vector<8x1xf32> to vector<8x16xf32>
    %179 = arith.mulf %178, %177 : vector<8x16xf32>
    %cst_60 = arith.constant dense<0.000000e+00> : vector<16xf32>
    %180 = vector.multi_reduction <add>, %179, %cst_60 [0] : vector<8x16xf32> to vector<16xf32>
    %181 = vector.shape_cast %180 : vector<16xf32> to vector<1x16xf32>
    %182 = vector.broadcast %108 : vector<1x1xf32> to vector<1x16xf32>
    %183 = arith.addf %181, %182 : vector<1x16xf32>
    %184 = arith.negf %183 : vector<1x16xf32>
    %185 = math.exp %184 : vector<1x16xf32>
    %cst_61 = arith.constant 1.000000e+00 : f32
    %186 = vector.broadcast %cst_61 : f32 to vector<1x16xf32>
    %187 = arith.addf %186, %185 : vector<1x16xf32>
    %188 = arith.divf %186, %187 : vector<1x16xf32>
    %c0_62 = arith.constant 0 : index
    %c0_63 = arith.constant 0 : index
    %189 = arith.index_cast %c1_i32_48 : i32 to index
    %c0_64 = arith.constant 0 : index
    %190 = vector.load %arg9[%c0_62, %c0_63, %189, %c0_64] : memref<1x1x8x16xf32, #tpu.memory_space<vmem>>, vector<1x1x1x16xf32>
    %191 = vector.shape_cast %190 : vector<1x1x1x16xf32> to vector<1x16xf32>
    %192 = vector.shape_cast %188 : vector<1x16xf32> to vector<1x1x1x16xf32>
    tpu.vector_store %arg9[%c0_62, %c0_63, %189, %c0_64], %192 {strides = array<i32>} : memref<1x1x8x16xf32, #tpu.memory_space<vmem>>, vector<1x1x1x16xf32>,
    %c2_i32_65 = arith.constant 2 : i32
    %c0_i32_66 = arith.constant 0 : i32
    %193 = arith.addi %c2_i32_65, %c0_i32_66 : i32
    %194 = arith.index_cast %193 : i32 to index
    %c0_67 = arith.constant 0 : index
    %c0_68 = arith.constant 0 : index
    %195 = vector.load %arg10[%194, %c0_67, %c0_68] : memref<10x8x18xf32, #tpu.memory_space<vmem>>, vector<1x8x18xf32>
    %196 = vector.shape_cast %195 : vector<1x8x18xf32> to vector<8x18xf32>
    %c1_i32_69 = arith.constant 1 : i32
    %197 = arith.addi %c2_i32_65, %c1_i32_69 : i32
    %198 = arith.index_cast %197 : i32 to index
    %c0_70 = arith.constant 0 : index
    %c0_71 = arith.constant 0 : index
    %199 = vector.load %arg10[%198, %c0_70, %c0_71] : memref<10x8x18xf32, #tpu.memory_space<vmem>>, vector<1x8x18xf32>
    %200 = vector.shape_cast %199 : vector<1x8x18xf32> to vector<8x18xf32>
    %c2_i32_72 = arith.constant 2 : i32
    %201 = arith.addi %c2_i32_65, %c2_i32_72 : i32
    %202 = arith.index_cast %201 : i32 to index
    %c0_73 = arith.constant 0 : index
    %c0_74 = arith.constant 0 : index
    %203 = vector.load %arg10[%202, %c0_73, %c0_74] : memref<10x8x18xf32, #tpu.memory_space<vmem>>, vector<1x8x18xf32>
    %204 = vector.shape_cast %203 : vector<1x8x18xf32> to vector<8x18xf32>
    %205 = vector.extract_strided_slice %196 {offsets = [0, 0], sizes = [8, 16], strides = [1, 1]} : vector<8x18xf32> to vector<8x16xf32>
    %206 = vector.extract_strided_slice %196 {offsets = [0, 1], sizes = [8, 16], strides = [1, 1]} : vector<8x18xf32> to vector<8x16xf32>
    %207 = vector.extract_strided_slice %196 {offsets = [0, 2], sizes = [8, 16], strides = [1, 1]} : vector<8x18xf32> to vector<8x16xf32>
    %208 = vector.extract_strided_slice %200 {offsets = [0, 0], sizes = [8, 16], strides = [1, 1]} : vector<8x18xf32> to vector<8x16xf32>
    %209 = vector.extract_strided_slice %200 {offsets = [0, 1], sizes = [8, 16], strides = [1, 1]} : vector<8x18xf32> to vector<8x16xf32>
    %210 = vector.extract_strided_slice %200 {offsets = [0, 2], sizes = [8, 16], strides = [1, 1]} : vector<8x18xf32> to vector<8x16xf32>
    %211 = vector.extract_strided_slice %204 {offsets = [0, 0], sizes = [8, 16], strides = [1, 1]} : vector<8x18xf32> to vector<8x16xf32>
    %212 = vector.extract_strided_slice %204 {offsets = [0, 1], sizes = [8, 16], strides = [1, 1]} : vector<8x18xf32> to vector<8x16xf32>
    %213 = vector.extract_strided_slice %204 {offsets = [0, 2], sizes = [8, 16], strides = [1, 1]} : vector<8x18xf32> to vector<8x16xf32>
    %214 = tpu.concatenate %205, %206, %207, %208, %209, %210, %211, %212, %213 in 0 : vector<8x16xf32>, vector<8x16xf32>, vector<8x16xf32>, vector<8x16xf32>, vector<8x16xf32>, vector<8x16xf32>, vector<8x16xf32>, vector<8x16xf32>, vector<8x16xf32> -> vector<72x16xf32>
    %cst_75 = arith.constant dense<0.000000e+00> : vector<8x16xf32>
    %215 = tpu.matmul %105, %214, %cst_75 {dimension_numbers = #tpu.dot_dimension_numbers<[1], [0], [0], [1], [0, 0, 1, 1], [], []>} : vector<8x72xf32>, vector<72x16xf32>, vector<8x16xf32> -> vector<8x16xf32>
    %216 = vector.broadcast %106 : vector<8x1xf32> to vector<8x16xf32>
    %217 = arith.addf %215, %216 : vector<8x16xf32>
    %cst_76 = arith.constant 0.000000e+00 : f32
    %218 = vector.broadcast %cst_76 : f32 to vector<8x16xf32>
    %219 = arith.maximumf %217, %218 : vector<8x16xf32>
    %220 = vector.broadcast %107 : vector<8x1xf32> to vector<8x16xf32>
    %221 = arith.mulf %220, %219 : vector<8x16xf32>
    %cst_77 = arith.constant dense<0.000000e+00> : vector<16xf32>
    %222 = vector.multi_reduction <add>, %221, %cst_77 [0] : vector<8x16xf32> to vector<16xf32>
    %223 = vector.shape_cast %222 : vector<16xf32> to vector<1x16xf32>
    %224 = vector.broadcast %108 : vector<1x1xf32> to vector<1x16xf32>
    %225 = arith.addf %223, %224 : vector<1x16xf32>
    %226 = arith.negf %225 : vector<1x16xf32>
    %227 = math.exp %226 : vector<1x16xf32>
    %cst_78 = arith.constant 1.000000e+00 : f32
    %228 = vector.broadcast %cst_78 : f32 to vector<1x16xf32>
    %229 = arith.addf %228, %227 : vector<1x16xf32>
    %230 = arith.divf %228, %229 : vector<1x16xf32>
    %c0_79 = arith.constant 0 : index
    %c0_80 = arith.constant 0 : index
    %231 = arith.index_cast %c2_i32_65 : i32 to index
    %c0_81 = arith.constant 0 : index
    %232 = vector.load %arg9[%c0_79, %c0_80, %231, %c0_81] : memref<1x1x8x16xf32, #tpu.memory_space<vmem>>, vector<1x1x1x16xf32>
    %233 = vector.shape_cast %232 : vector<1x1x1x16xf32> to vector<1x16xf32>
    %234 = vector.shape_cast %230 : vector<1x16xf32> to vector<1x1x1x16xf32>
    tpu.vector_store %arg9[%c0_79, %c0_80, %231, %c0_81], %234 {strides = array<i32>} : memref<1x1x8x16xf32, #tpu.memory_space<vmem>>, vector<1x1x1x16xf32>,
    %c3_i32 = arith.constant 3 : i32
    %c0_i32_82 = arith.constant 0 : i32
    %235 = arith.addi %c3_i32, %c0_i32_82 : i32
    %236 = arith.index_cast %235 : i32 to index
    %c0_83 = arith.constant 0 : index
    %c0_84 = arith.constant 0 : index
    %237 = vector.load %arg10[%236, %c0_83, %c0_84] : memref<10x8x18xf32, #tpu.memory_space<vmem>>, vector<1x8x18xf32>
    %238 = vector.shape_cast %237 : vector<1x8x18xf32> to vector<8x18xf32>
    %c1_i32_85 = arith.constant 1 : i32
    %239 = arith.addi %c3_i32, %c1_i32_85 : i32
    %240 = arith.index_cast %239 : i32 to index
    %c0_86 = arith.constant 0 : index
    %c0_87 = arith.constant 0 : index
    %241 = vector.load %arg10[%240, %c0_86, %c0_87] : memref<10x8x18xf32, #tpu.memory_space<vmem>>, vector<1x8x18xf32>
    %242 = vector.shape_cast %241 : vector<1x8x18xf32> to vector<8x18xf32>
    %c2_i32_88 = arith.constant 2 : i32
    %243 = arith.addi %c3_i32, %c2_i32_88 : i32
    %244 = arith.index_cast %243 : i32 to index
    %c0_89 = arith.constant 0 : index
    %c0_90 = arith.constant 0 : index
    %245 = vector.load %arg10[%244, %c0_89, %c0_90] : memref<10x8x18xf32, #tpu.memory_space<vmem>>, vector<1x8x18xf32>
    %246 = vector.shape_cast %245 : vector<1x8x18xf32> to vector<8x18xf32>
    %247 = vector.extract_strided_slice %238 {offsets = [0, 0], sizes = [8, 16], strides = [1, 1]} : vector<8x18xf32> to vector<8x16xf32>
    %248 = vector.extract_strided_slice %238 {offsets = [0, 1], sizes = [8, 16], strides = [1, 1]} : vector<8x18xf32> to vector<8x16xf32>
    %249 = vector.extract_strided_slice %238 {offsets = [0, 2], sizes = [8, 16], strides = [1, 1]} : vector<8x18xf32> to vector<8x16xf32>
    %250 = vector.extract_strided_slice %242 {offsets = [0, 0], sizes = [8, 16], strides = [1, 1]} : vector<8x18xf32> to vector<8x16xf32>
    %251 = vector.extract_strided_slice %242 {offsets = [0, 1], sizes = [8, 16], strides = [1, 1]} : vector<8x18xf32> to vector<8x16xf32>
    %252 = vector.extract_strided_slice %242 {offsets = [0, 2], sizes = [8, 16], strides = [1, 1]} : vector<8x18xf32> to vector<8x16xf32>
    %253 = vector.extract_strided_slice %246 {offsets = [0, 0], sizes = [8, 16], strides = [1, 1]} : vector<8x18xf32> to vector<8x16xf32>
    %254 = vector.extract_strided_slice %246 {offsets = [0, 1], sizes = [8, 16], strides = [1, 1]} : vector<8x18xf32> to vector<8x16xf32>
    %255 = vector.extract_strided_slice %246 {offsets = [0, 2], sizes = [8, 16], strides = [1, 1]} : vector<8x18xf32> to vector<8x16xf32>
    %256 = tpu.concatenate %247, %248, %249, %250, %251, %252, %253, %254, %255 in 0 : vector<8x16xf32>, vector<8x16xf32>, vector<8x16xf32>, vector<8x16xf32>, vector<8x16xf32>, vector<8x16xf32>, vector<8x16xf32>, vector<8x16xf32>, vector<8x16xf32> -> vector<72x16xf32>
    %cst_91 = arith.constant dense<0.000000e+00> : vector<8x16xf32>
    %257 = tpu.matmul %105, %256, %cst_91 {dimension_numbers = #tpu.dot_dimension_numbers<[1], [0], [0], [1], [0, 0, 1, 1], [], []>} : vector<8x72xf32>, vector<72x16xf32>, vector<8x16xf32> -> vector<8x16xf32>
    %258 = vector.broadcast %106 : vector<8x1xf32> to vector<8x16xf32>
    %259 = arith.addf %257, %258 : vector<8x16xf32>
    %cst_92 = arith.constant 0.000000e+00 : f32
    %260 = vector.broadcast %cst_92 : f32 to vector<8x16xf32>
    %261 = arith.maximumf %259, %260 : vector<8x16xf32>
    %262 = vector.broadcast %107 : vector<8x1xf32> to vector<8x16xf32>
    %263 = arith.mulf %262, %261 : vector<8x16xf32>
    %cst_93 = arith.constant dense<0.000000e+00> : vector<16xf32>
    %264 = vector.multi_reduction <add>, %263, %cst_93 [0] : vector<8x16xf32> to vector<16xf32>
    %265 = vector.shape_cast %264 : vector<16xf32> to vector<1x16xf32>
    %266 = vector.broadcast %108 : vector<1x1xf32> to vector<1x16xf32>
    %267 = arith.addf %265, %266 : vector<1x16xf32>
    %268 = arith.negf %267 : vector<1x16xf32>
    %269 = math.exp %268 : vector<1x16xf32>
    %cst_94 = arith.constant 1.000000e+00 : f32
    %270 = vector.broadcast %cst_94 : f32 to vector<1x16xf32>
    %271 = arith.addf %270, %269 : vector<1x16xf32>
    %272 = arith.divf %270, %271 : vector<1x16xf32>
    %c0_95 = arith.constant 0 : index
    %c0_96 = arith.constant 0 : index
    %273 = arith.index_cast %c3_i32 : i32 to index
    %c0_97 = arith.constant 0 : index
    %274 = vector.load %arg9[%c0_95, %c0_96, %273, %c0_97] : memref<1x1x8x16xf32, #tpu.memory_space<vmem>>, vector<1x1x1x16xf32>
    %275 = vector.shape_cast %274 : vector<1x1x1x16xf32> to vector<1x16xf32>
    %276 = vector.shape_cast %272 : vector<1x16xf32> to vector<1x1x1x16xf32>
    tpu.vector_store %arg9[%c0_95, %c0_96, %273, %c0_97], %276 {strides = array<i32>} : memref<1x1x8x16xf32, #tpu.memory_space<vmem>>, vector<1x1x1x16xf32>,
    %c4_i32 = arith.constant 4 : i32
    %c0_i32_98 = arith.constant 0 : i32
    %277 = arith.addi %c4_i32, %c0_i32_98 : i32
    %278 = arith.index_cast %277 : i32 to index
    %c0_99 = arith.constant 0 : index
    %c0_100 = arith.constant 0 : index
    %279 = vector.load %arg10[%278, %c0_99, %c0_100] : memref<10x8x18xf32, #tpu.memory_space<vmem>>, vector<1x8x18xf32>
    %280 = vector.shape_cast %279 : vector<1x8x18xf32> to vector<8x18xf32>
    %c1_i32_101 = arith.constant 1 : i32
    %281 = arith.addi %c4_i32, %c1_i32_101 : i32
    %282 = arith.index_cast %281 : i32 to index
    %c0_102 = arith.constant 0 : index
    %c0_103 = arith.constant 0 : index
    %283 = vector.load %arg10[%282, %c0_102, %c0_103] : memref<10x8x18xf32, #tpu.memory_space<vmem>>, vector<1x8x18xf32>
    %284 = vector.shape_cast %283 : vector<1x8x18xf32> to vector<8x18xf32>
    %c2_i32_104 = arith.constant 2 : i32
    %285 = arith.addi %c4_i32, %c2_i32_104 : i32
    %286 = arith.index_cast %285 : i32 to index
    %c0_105 = arith.constant 0 : index
    %c0_106 = arith.constant 0 : index
    %287 = vector.load %arg10[%286, %c0_105, %c0_106] : memref<10x8x18xf32, #tpu.memory_space<vmem>>, vector<1x8x18xf32>
    %288 = vector.shape_cast %287 : vector<1x8x18xf32> to vector<8x18xf32>
    %289 = vector.extract_strided_slice %280 {offsets = [0, 0], sizes = [8, 16], strides = [1, 1]} : vector<8x18xf32> to vector<8x16xf32>
    %290 = vector.extract_strided_slice %280 {offsets = [0, 1], sizes = [8, 16], strides = [1, 1]} : vector<8x18xf32> to vector<8x16xf32>
    %291 = vector.extract_strided_slice %280 {offsets = [0, 2], sizes = [8, 16], strides = [1, 1]} : vector<8x18xf32> to vector<8x16xf32>
    %292 = vector.extract_strided_slice %284 {offsets = [0, 0], sizes = [8, 16], strides = [1, 1]} : vector<8x18xf32> to vector<8x16xf32>
    %293 = vector.extract_strided_slice %284 {offsets = [0, 1], sizes = [8, 16], strides = [1, 1]} : vector<8x18xf32> to vector<8x16xf32>
    %294 = vector.extract_strided_slice %284 {offsets = [0, 2], sizes = [8, 16], strides = [1, 1]} : vector<8x18xf32> to vector<8x16xf32>
    %295 = vector.extract_strided_slice %288 {offsets = [0, 0], sizes = [8, 16], strides = [1, 1]} : vector<8x18xf32> to vector<8x16xf32>
    %296 = vector.extract_strided_slice %288 {offsets = [0, 1], sizes = [8, 16], strides = [1, 1]} : vector<8x18xf32> to vector<8x16xf32>
    %297 = vector.extract_strided_slice %288 {offsets = [0, 2], sizes = [8, 16], strides = [1, 1]} : vector<8x18xf32> to vector<8x16xf32>
    %298 = tpu.concatenate %289, %290, %291, %292, %293, %294, %295, %296, %297 in 0 : vector<8x16xf32>, vector<8x16xf32>, vector<8x16xf32>, vector<8x16xf32>, vector<8x16xf32>, vector<8x16xf32>, vector<8x16xf32>, vector<8x16xf32>, vector<8x16xf32> -> vector<72x16xf32>
    %cst_107 = arith.constant dense<0.000000e+00> : vector<8x16xf32>
    %299 = tpu.matmul %105, %298, %cst_107 {dimension_numbers = #tpu.dot_dimension_numbers<[1], [0], [0], [1], [0, 0, 1, 1], [], []>} : vector<8x72xf32>, vector<72x16xf32>, vector<8x16xf32> -> vector<8x16xf32>
    %300 = vector.broadcast %106 : vector<8x1xf32> to vector<8x16xf32>
    %301 = arith.addf %299, %300 : vector<8x16xf32>
    %cst_108 = arith.constant 0.000000e+00 : f32
    %302 = vector.broadcast %cst_108 : f32 to vector<8x16xf32>
    %303 = arith.maximumf %301, %302 : vector<8x16xf32>
    %304 = vector.broadcast %107 : vector<8x1xf32> to vector<8x16xf32>
    %305 = arith.mulf %304, %303 : vector<8x16xf32>
    %cst_109 = arith.constant dense<0.000000e+00> : vector<16xf32>
    %306 = vector.multi_reduction <add>, %305, %cst_109 [0] : vector<8x16xf32> to vector<16xf32>
    %307 = vector.shape_cast %306 : vector<16xf32> to vector<1x16xf32>
    %308 = vector.broadcast %108 : vector<1x1xf32> to vector<1x16xf32>
    %309 = arith.addf %307, %308 : vector<1x16xf32>
    %310 = arith.negf %309 : vector<1x16xf32>
    %311 = math.exp %310 : vector<1x16xf32>
    %cst_110 = arith.constant 1.000000e+00 : f32
    %312 = vector.broadcast %cst_110 : f32 to vector<1x16xf32>
    %313 = arith.addf %312, %311 : vector<1x16xf32>
    %314 = arith.divf %312, %313 : vector<1x16xf32>
    %c0_111 = arith.constant 0 : index
    %c0_112 = arith.constant 0 : index
    %315 = arith.index_cast %c4_i32 : i32 to index
    %c0_113 = arith.constant 0 : index
    %316 = vector.load %arg9[%c0_111, %c0_112, %315, %c0_113] : memref<1x1x8x16xf32, #tpu.memory_space<vmem>>, vector<1x1x1x16xf32>
    %317 = vector.shape_cast %316 : vector<1x1x1x16xf32> to vector<1x16xf32>
    %318 = vector.shape_cast %314 : vector<1x16xf32> to vector<1x1x1x16xf32>
    tpu.vector_store %arg9[%c0_111, %c0_112, %315, %c0_113], %318 {strides = array<i32>} : memref<1x1x8x16xf32, #tpu.memory_space<vmem>>, vector<1x1x1x16xf32>,
    %c5_i32 = arith.constant 5 : i32
    %c0_i32_114 = arith.constant 0 : i32
    %319 = arith.addi %c5_i32, %c0_i32_114 : i32
    %320 = arith.index_cast %319 : i32 to index
    %c0_115 = arith.constant 0 : index
    %c0_116 = arith.constant 0 : index
    %321 = vector.load %arg10[%320, %c0_115, %c0_116] : memref<10x8x18xf32, #tpu.memory_space<vmem>>, vector<1x8x18xf32>
    %322 = vector.shape_cast %321 : vector<1x8x18xf32> to vector<8x18xf32>
    %c1_i32_117 = arith.constant 1 : i32
    %323 = arith.addi %c5_i32, %c1_i32_117 : i32
    %324 = arith.index_cast %323 : i32 to index
    %c0_118 = arith.constant 0 : index
    %c0_119 = arith.constant 0 : index
    %325 = vector.load %arg10[%324, %c0_118, %c0_119] : memref<10x8x18xf32, #tpu.memory_space<vmem>>, vector<1x8x18xf32>
    %326 = vector.shape_cast %325 : vector<1x8x18xf32> to vector<8x18xf32>
    %c2_i32_120 = arith.constant 2 : i32
    %327 = arith.addi %c5_i32, %c2_i32_120 : i32
    %328 = arith.index_cast %327 : i32 to index
    %c0_121 = arith.constant 0 : index
    %c0_122 = arith.constant 0 : index
    %329 = vector.load %arg10[%328, %c0_121, %c0_122] : memref<10x8x18xf32, #tpu.memory_space<vmem>>, vector<1x8x18xf32>
    %330 = vector.shape_cast %329 : vector<1x8x18xf32> to vector<8x18xf32>
    %331 = vector.extract_strided_slice %322 {offsets = [0, 0], sizes = [8, 16], strides = [1, 1]} : vector<8x18xf32> to vector<8x16xf32>
    %332 = vector.extract_strided_slice %322 {offsets = [0, 1], sizes = [8, 16], strides = [1, 1]} : vector<8x18xf32> to vector<8x16xf32>
    %333 = vector.extract_strided_slice %322 {offsets = [0, 2], sizes = [8, 16], strides = [1, 1]} : vector<8x18xf32> to vector<8x16xf32>
    %334 = vector.extract_strided_slice %326 {offsets = [0, 0], sizes = [8, 16], strides = [1, 1]} : vector<8x18xf32> to vector<8x16xf32>
    %335 = vector.extract_strided_slice %326 {offsets = [0, 1], sizes = [8, 16], strides = [1, 1]} : vector<8x18xf32> to vector<8x16xf32>
    %336 = vector.extract_strided_slice %326 {offsets = [0, 2], sizes = [8, 16], strides = [1, 1]} : vector<8x18xf32> to vector<8x16xf32>
    %337 = vector.extract_strided_slice %330 {offsets = [0, 0], sizes = [8, 16], strides = [1, 1]} : vector<8x18xf32> to vector<8x16xf32>
    %338 = vector.extract_strided_slice %330 {offsets = [0, 1], sizes = [8, 16], strides = [1, 1]} : vector<8x18xf32> to vector<8x16xf32>
    %339 = vector.extract_strided_slice %330 {offsets = [0, 2], sizes = [8, 16], strides = [1, 1]} : vector<8x18xf32> to vector<8x16xf32>
    %340 = tpu.concatenate %331, %332, %333, %334, %335, %336, %337, %338, %339 in 0 : vector<8x16xf32>, vector<8x16xf32>, vector<8x16xf32>, vector<8x16xf32>, vector<8x16xf32>, vector<8x16xf32>, vector<8x16xf32>, vector<8x16xf32>, vector<8x16xf32> -> vector<72x16xf32>
    %cst_123 = arith.constant dense<0.000000e+00> : vector<8x16xf32>
    %341 = tpu.matmul %105, %340, %cst_123 {dimension_numbers = #tpu.dot_dimension_numbers<[1], [0], [0], [1], [0, 0, 1, 1], [], []>} : vector<8x72xf32>, vector<72x16xf32>, vector<8x16xf32> -> vector<8x16xf32>
    %342 = vector.broadcast %106 : vector<8x1xf32> to vector<8x16xf32>
    %343 = arith.addf %341, %342 : vector<8x16xf32>
    %cst_124 = arith.constant 0.000000e+00 : f32
    %344 = vector.broadcast %cst_124 : f32 to vector<8x16xf32>
    %345 = arith.maximumf %343, %344 : vector<8x16xf32>
    %346 = vector.broadcast %107 : vector<8x1xf32> to vector<8x16xf32>
    %347 = arith.mulf %346, %345 : vector<8x16xf32>
    %cst_125 = arith.constant dense<0.000000e+00> : vector<16xf32>
    %348 = vector.multi_reduction <add>, %347, %cst_125 [0] : vector<8x16xf32> to vector<16xf32>
    %349 = vector.shape_cast %348 : vector<16xf32> to vector<1x16xf32>
    %350 = vector.broadcast %108 : vector<1x1xf32> to vector<1x16xf32>
    %351 = arith.addf %349, %350 : vector<1x16xf32>
    %352 = arith.negf %351 : vector<1x16xf32>
    %353 = math.exp %352 : vector<1x16xf32>
    %cst_126 = arith.constant 1.000000e+00 : f32
    %354 = vector.broadcast %cst_126 : f32 to vector<1x16xf32>
    %355 = arith.addf %354, %353 : vector<1x16xf32>
    %356 = arith.divf %354, %355 : vector<1x16xf32>
    %c0_127 = arith.constant 0 : index
    %c0_128 = arith.constant 0 : index
    %357 = arith.index_cast %c5_i32 : i32 to index
    %c0_129 = arith.constant 0 : index
    %358 = vector.load %arg9[%c0_127, %c0_128, %357, %c0_129] : memref<1x1x8x16xf32, #tpu.memory_space<vmem>>, vector<1x1x1x16xf32>
    %359 = vector.shape_cast %358 : vector<1x1x1x16xf32> to vector<1x16xf32>
    %360 = vector.shape_cast %356 : vector<1x16xf32> to vector<1x1x1x16xf32>
    tpu.vector_store %arg9[%c0_127, %c0_128, %357, %c0_129], %360 {strides = array<i32>} : memref<1x1x8x16xf32, #tpu.memory_space<vmem>>, vector<1x1x1x16xf32>,
    %c6_i32 = arith.constant 6 : i32
    %c0_i32_130 = arith.constant 0 : i32
    %361 = arith.addi %c6_i32, %c0_i32_130 : i32
    %362 = arith.index_cast %361 : i32 to index
    %c0_131 = arith.constant 0 : index
    %c0_132 = arith.constant 0 : index
    %363 = vector.load %arg10[%362, %c0_131, %c0_132] : memref<10x8x18xf32, #tpu.memory_space<vmem>>, vector<1x8x18xf32>
    %364 = vector.shape_cast %363 : vector<1x8x18xf32> to vector<8x18xf32>
    %c1_i32_133 = arith.constant 1 : i32
    %365 = arith.addi %c6_i32, %c1_i32_133 : i32
    %366 = arith.index_cast %365 : i32 to index
    %c0_134 = arith.constant 0 : index
    %c0_135 = arith.constant 0 : index
    %367 = vector.load %arg10[%366, %c0_134, %c0_135] : memref<10x8x18xf32, #tpu.memory_space<vmem>>, vector<1x8x18xf32>
    %368 = vector.shape_cast %367 : vector<1x8x18xf32> to vector<8x18xf32>
    %c2_i32_136 = arith.constant 2 : i32
    %369 = arith.addi %c6_i32, %c2_i32_136 : i32
    %370 = arith.index_cast %369 : i32 to index
    %c0_137 = arith.constant 0 : index
    %c0_138 = arith.constant 0 : index
    %371 = vector.load %arg10[%370, %c0_137, %c0_138] : memref<10x8x18xf32, #tpu.memory_space<vmem>>, vector<1x8x18xf32>
    %372 = vector.shape_cast %371 : vector<1x8x18xf32> to vector<8x18xf32>
    %373 = vector.extract_strided_slice %364 {offsets = [0, 0], sizes = [8, 16], strides = [1, 1]} : vector<8x18xf32> to vector<8x16xf32>
    %374 = vector.extract_strided_slice %364 {offsets = [0, 1], sizes = [8, 16], strides = [1, 1]} : vector<8x18xf32> to vector<8x16xf32>
    %375 = vector.extract_strided_slice %364 {offsets = [0, 2], sizes = [8, 16], strides = [1, 1]} : vector<8x18xf32> to vector<8x16xf32>
    %376 = vector.extract_strided_slice %368 {offsets = [0, 0], sizes = [8, 16], strides = [1, 1]} : vector<8x18xf32> to vector<8x16xf32>
    %377 = vector.extract_strided_slice %368 {offsets = [0, 1], sizes = [8, 16], strides = [1, 1]} : vector<8x18xf32> to vector<8x16xf32>
    %378 = vector.extract_strided_slice %368 {offsets = [0, 2], sizes = [8, 16], strides = [1, 1]} : vector<8x18xf32> to vector<8x16xf32>
    %379 = vector.extract_strided_slice %372 {offsets = [0, 0], sizes = [8, 16], strides = [1, 1]} : vector<8x18xf32> to vector<8x16xf32>
    %380 = vector.extract_strided_slice %372 {offsets = [0, 1], sizes = [8, 16], strides = [1, 1]} : vector<8x18xf32> to vector<8x16xf32>
    %381 = vector.extract_strided_slice %372 {offsets = [0, 2], sizes = [8, 16], strides = [1, 1]} : vector<8x18xf32> to vector<8x16xf32>
    %382 = tpu.concatenate %373, %374, %375, %376, %377, %378, %379, %380, %381 in 0 : vector<8x16xf32>, vector<8x16xf32>, vector<8x16xf32>, vector<8x16xf32>, vector<8x16xf32>, vector<8x16xf32>, vector<8x16xf32>, vector<8x16xf32>, vector<8x16xf32> -> vector<72x16xf32>
    %cst_139 = arith.constant dense<0.000000e+00> : vector<8x16xf32>
    %383 = tpu.matmul %105, %382, %cst_139 {dimension_numbers = #tpu.dot_dimension_numbers<[1], [0], [0], [1], [0, 0, 1, 1], [], []>} : vector<8x72xf32>, vector<72x16xf32>, vector<8x16xf32> -> vector<8x16xf32>
    %384 = vector.broadcast %106 : vector<8x1xf32> to vector<8x16xf32>
    %385 = arith.addf %383, %384 : vector<8x16xf32>
    %cst_140 = arith.constant 0.000000e+00 : f32
    %386 = vector.broadcast %cst_140 : f32 to vector<8x16xf32>
    %387 = arith.maximumf %385, %386 : vector<8x16xf32>
    %388 = vector.broadcast %107 : vector<8x1xf32> to vector<8x16xf32>
    %389 = arith.mulf %388, %387 : vector<8x16xf32>
    %cst_141 = arith.constant dense<0.000000e+00> : vector<16xf32>
    %390 = vector.multi_reduction <add>, %389, %cst_141 [0] : vector<8x16xf32> to vector<16xf32>
    %391 = vector.shape_cast %390 : vector<16xf32> to vector<1x16xf32>
    %392 = vector.broadcast %108 : vector<1x1xf32> to vector<1x16xf32>
    %393 = arith.addf %391, %392 : vector<1x16xf32>
    %394 = arith.negf %393 : vector<1x16xf32>
    %395 = math.exp %394 : vector<1x16xf32>
    %cst_142 = arith.constant 1.000000e+00 : f32
    %396 = vector.broadcast %cst_142 : f32 to vector<1x16xf32>
    %397 = arith.addf %396, %395 : vector<1x16xf32>
    %398 = arith.divf %396, %397 : vector<1x16xf32>
    %c0_143 = arith.constant 0 : index
    %c0_144 = arith.constant 0 : index
    %399 = arith.index_cast %c6_i32 : i32 to index
    %c0_145 = arith.constant 0 : index
    %400 = vector.load %arg9[%c0_143, %c0_144, %399, %c0_145] : memref<1x1x8x16xf32, #tpu.memory_space<vmem>>, vector<1x1x1x16xf32>
    %401 = vector.shape_cast %400 : vector<1x1x1x16xf32> to vector<1x16xf32>
    %402 = vector.shape_cast %398 : vector<1x16xf32> to vector<1x1x1x16xf32>
    tpu.vector_store %arg9[%c0_143, %c0_144, %399, %c0_145], %402 {strides = array<i32>} : memref<1x1x8x16xf32, #tpu.memory_space<vmem>>, vector<1x1x1x16xf32>,
    %c7_i32 = arith.constant 7 : i32
    %c0_i32_146 = arith.constant 0 : i32
    %403 = arith.addi %c7_i32, %c0_i32_146 : i32
    %404 = arith.index_cast %403 : i32 to index
    %c0_147 = arith.constant 0 : index
    %c0_148 = arith.constant 0 : index
    %405 = vector.load %arg10[%404, %c0_147, %c0_148] : memref<10x8x18xf32, #tpu.memory_space<vmem>>, vector<1x8x18xf32>
    %406 = vector.shape_cast %405 : vector<1x8x18xf32> to vector<8x18xf32>
    %c1_i32_149 = arith.constant 1 : i32
    %407 = arith.addi %c7_i32, %c1_i32_149 : i32
    %408 = arith.index_cast %407 : i32 to index
    %c0_150 = arith.constant 0 : index
    %c0_151 = arith.constant 0 : index
    %409 = vector.load %arg10[%408, %c0_150, %c0_151] : memref<10x8x18xf32, #tpu.memory_space<vmem>>, vector<1x8x18xf32>
    %410 = vector.shape_cast %409 : vector<1x8x18xf32> to vector<8x18xf32>
    %c2_i32_152 = arith.constant 2 : i32
    %411 = arith.addi %c7_i32, %c2_i32_152 : i32
    %412 = arith.index_cast %411 : i32 to index
    %c0_153 = arith.constant 0 : index
    %c0_154 = arith.constant 0 : index
    %413 = vector.load %arg10[%412, %c0_153, %c0_154] : memref<10x8x18xf32, #tpu.memory_space<vmem>>, vector<1x8x18xf32>
    %414 = vector.shape_cast %413 : vector<1x8x18xf32> to vector<8x18xf32>
    %415 = vector.extract_strided_slice %406 {offsets = [0, 0], sizes = [8, 16], strides = [1, 1]} : vector<8x18xf32> to vector<8x16xf32>
    %416 = vector.extract_strided_slice %406 {offsets = [0, 1], sizes = [8, 16], strides = [1, 1]} : vector<8x18xf32> to vector<8x16xf32>
    %417 = vector.extract_strided_slice %406 {offsets = [0, 2], sizes = [8, 16], strides = [1, 1]} : vector<8x18xf32> to vector<8x16xf32>
    %418 = vector.extract_strided_slice %410 {offsets = [0, 0], sizes = [8, 16], strides = [1, 1]} : vector<8x18xf32> to vector<8x16xf32>
    %419 = vector.extract_strided_slice %410 {offsets = [0, 1], sizes = [8, 16], strides = [1, 1]} : vector<8x18xf32> to vector<8x16xf32>
    %420 = vector.extract_strided_slice %410 {offsets = [0, 2], sizes = [8, 16], strides = [1, 1]} : vector<8x18xf32> to vector<8x16xf32>
    %421 = vector.extract_strided_slice %414 {offsets = [0, 0], sizes = [8, 16], strides = [1, 1]} : vector<8x18xf32> to vector<8x16xf32>
    %422 = vector.extract_strided_slice %414 {offsets = [0, 1], sizes = [8, 16], strides = [1, 1]} : vector<8x18xf32> to vector<8x16xf32>
    %423 = vector.extract_strided_slice %414 {offsets = [0, 2], sizes = [8, 16], strides = [1, 1]} : vector<8x18xf32> to vector<8x16xf32>
    %424 = tpu.concatenate %415, %416, %417, %418, %419, %420, %421, %422, %423 in 0 : vector<8x16xf32>, vector<8x16xf32>, vector<8x16xf32>, vector<8x16xf32>, vector<8x16xf32>, vector<8x16xf32>, vector<8x16xf32>, vector<8x16xf32>, vector<8x16xf32> -> vector<72x16xf32>
    %cst_155 = arith.constant dense<0.000000e+00> : vector<8x16xf32>
    %425 = tpu.matmul %105, %424, %cst_155 {dimension_numbers = #tpu.dot_dimension_numbers<[1], [0], [0], [1], [0, 0, 1, 1], [], []>} : vector<8x72xf32>, vector<72x16xf32>, vector<8x16xf32> -> vector<8x16xf32>
    %426 = vector.broadcast %106 : vector<8x1xf32> to vector<8x16xf32>
    %427 = arith.addf %425, %426 : vector<8x16xf32>
    %cst_156 = arith.constant 0.000000e+00 : f32
    %428 = vector.broadcast %cst_156 : f32 to vector<8x16xf32>
    %429 = arith.maximumf %427, %428 : vector<8x16xf32>
    %430 = vector.broadcast %107 : vector<8x1xf32> to vector<8x16xf32>
    %431 = arith.mulf %430, %429 : vector<8x16xf32>
    %cst_157 = arith.constant dense<0.000000e+00> : vector<16xf32>
    %432 = vector.multi_reduction <add>, %431, %cst_157 [0] : vector<8x16xf32> to vector<16xf32>
    %433 = vector.shape_cast %432 : vector<16xf32> to vector<1x16xf32>
    %434 = vector.broadcast %108 : vector<1x1xf32> to vector<1x16xf32>
    %435 = arith.addf %433, %434 : vector<1x16xf32>
    %436 = arith.negf %435 : vector<1x16xf32>
    %437 = math.exp %436 : vector<1x16xf32>
    %cst_158 = arith.constant 1.000000e+00 : f32
    %438 = vector.broadcast %cst_158 : f32 to vector<1x16xf32>
    %439 = arith.addf %438, %437 : vector<1x16xf32>
    %440 = arith.divf %438, %439 : vector<1x16xf32>
    %c0_159 = arith.constant 0 : index
    %c0_160 = arith.constant 0 : index
    %441 = arith.index_cast %c7_i32 : i32 to index
    %c0_161 = arith.constant 0 : index
    %442 = vector.load %arg9[%c0_159, %c0_160, %441, %c0_161] : memref<1x1x8x16xf32, #tpu.memory_space<vmem>>, vector<1x1x1x16xf32>
    %443 = vector.shape_cast %442 : vector<1x1x1x16xf32> to vector<1x16xf32>
    %444 = vector.shape_cast %440 : vector<1x16xf32> to vector<1x1x1x16xf32>
    tpu.vector_store %arg9[%c0_159, %c0_160, %441, %c0_161], %444 {strides = array<i32>} : memref<1x1x8x16xf32, #tpu.memory_space<vmem>>, vector<1x1x1x16xf32>,
    %c8_i32_162 = arith.constant 8 : i32
    return
  }
  func.func @transform_0(%arg0: i32, %arg1: i32) -> (i32, i32, i32, i32) {
    %c0_i32 = arith.constant 0 : i32
    %c0_i32_0 = arith.constant 0 : i32
    %c0_i32_1 = arith.constant 0 : i32
    %c0_i32_2 = arith.constant 0 : i32
    return %arg0, %c0_i32, %c0_i32_0, %c0_i32_1 : i32, i32, i32, i32
  }
  func.func @transform_1(%arg0: i32, %arg1: i32) -> (i32, i32, i32) {
    %c0_i32 = arith.constant 0 : i32
    %c0_i32_0 = arith.constant 0 : i32
    %c0_i32_1 = arith.constant 0 : i32
    %c0_i32_2 = arith.constant 0 : i32
    return %c0_i32, %c0_i32_0, %c0_i32_1 : i32, i32, i32
  }
  func.func @transform_2(%arg0: i32, %arg1: i32) -> (i32, i32, i32) {
    %c0_i32 = arith.constant 0 : i32
    %c0_i32_0 = arith.constant 0 : i32
    %c0_i32_1 = arith.constant 0 : i32
    %c0_i32_2 = arith.constant 0 : i32
    return %c0_i32, %c0_i32_0, %c0_i32_1 : i32, i32, i32
  }
  func.func @transform_3(%arg0: i32, %arg1: i32) -> (i32, i32) {
    %c0_i32 = arith.constant 0 : i32
    %c0_i32_0 = arith.constant 0 : i32
    %c0_i32_1 = arith.constant 0 : i32
    return %c0_i32, %c0_i32_0 : i32, i32
  }
  func.func @transform_4(%arg0: i32, %arg1: i32) -> (i32, i32) {
    %c0_i32 = arith.constant 0 : i32
    %c0_i32_0 = arith.constant 0 : i32
    %c0_i32_1 = arith.constant 0 : i32
    return %c0_i32, %c0_i32_0 : i32, i32
  }
  func.func @transform_5(%arg0: i32, %arg1: i32) -> (i32, i32) {
    %c0_i32 = arith.constant 0 : i32
    %c0_i32_0 = arith.constant 0 : i32
    %c0_i32_1 = arith.constant 0 : i32
    return %c0_i32, %c0_i32_0 : i32, i32
  }
  func.func @transform_6(%arg0: i32, %arg1: i32) -> (i32, i32) {
    %c0_i32 = arith.constant 0 : i32
    %c0_i32_0 = arith.constant 0 : i32
    %c0_i32_1 = arith.constant 0 : i32
    return %c0_i32, %c0_i32_0 : i32, i32
  }
  func.func @transform_7(%arg0: i32, %arg1: i32) -> (i32, i32, i32, i32) {
    %c0_i32 = arith.constant 0 : i32
    %c0_i32_0 = arith.constant 0 : i32
    %c0_i32_1 = arith.constant 0 : i32
    return %arg0, %c0_i32, %arg1, %c0_i32_0 : i32, i32, i32, i32
  }
}

</mosaic_0001>

<bundles_post_ra>
// kernel: net_forward.1
= control target key start
LH: loop header
LB: loop body
LE: loop exit
PB: predicated region body
PF: predicated region fallthrough
CT: control target
= control target key end

     0   :  { %s3891_s0 = inlined_call_operand.vmem [shape: f32[2,1,20,18], index: 0, kind: input, shape index: {}]   ;;  %s3892_s1 = inlined_call_operand.vmem [shape: f32[9,8,1], index: 1, kind: input, shape index: {}]   ;;  %s3893_s2 = inlined_call_operand.vmem [shape: f32[1,8,1], index: 2, kind: input, shape index: {}]   ;;  %s3894_s3 = inlined_call_operand.vmem [shape: f32[8,72], index: 3, kind: input, shape index: {}]   ;;  %s3895_s4 = inlined_call_operand.vmem [shape: f32[8,1], index: 4, kind: input, shape index: {}]   ;;  %s3896_s5 = inlined_call_operand.vmem [shape: f32[8,1], index: 5, kind: input, shape index: {}]   ;;  %s3897_s6 = inlined_call_operand.<no memory space> [shape: f32[1,1], index: 6, kind: input, shape index: {}]   ;;  %s3898_s7 = inlined_call_operand.hbm [shape: f32[2,1,16,16], index: 7, kind: output, shape index: {}]  }
   0x1   :  { %v12_v0 = vstv %s3897_s6 }
   0x2   :  { %13 = vst [vmem:[#allocation3] sm:$0x1] %v12_v0 }
   0x3   :  { %14 = vsyncpa [#allocation5], 0 }
   0x4   :  { %16 = vsyncpa [#allocation5 + $0x1], 0  ;;  %s3035_s26 = smov 0   ;;  %s3037_s27 = smov 0  }
   0x5   :  { %s3039_s28 = smov 0   ;;  %s3041_s29 = smov 0  }
   0x6   :  { %s3043_s30 = smov 0   ;;  %s3045_s8 = smov 0  }
   0x7   :  { %s3047_s9 = smov 0   ;;  %s3049_s10 = smov 0  }
   0x8 LB: > { %s2280_s6 = sadd.s32 4294967295, %s2979_s10   ;;  %s2281_s11 = sadd.s32 4294967294, %s2979_s10   ;;  %s2979_s10 = sphi %s3049_s10, %s22_s10   ;;  %s2975_s9 = sphi %s3047_s9, %s3910_s9   ;;  %s2971_s8 = sphi %s3045_s8, %s3909_s8   ;;  %s2967_s30 = sphi %s3043_s30, %s3908_s30   ;;  %s2963_s29 = sphi %s3041_s29, %s3907_s29   ;;  %s2959_s28 = sphi %s3039_s28, %s3906_s28   ;;  %s2955_s27 = sphi %s3037_s27, %s3905_s27   ;;  %s2951_s26 = sphi %s3035_s26, %s3904_s26  }
   0x9   : > { %s31_s12 = sadd.s32 1, %s2971_s8  ;;  %s34_s13 = sadd.s32 1, %s2975_s9 }
   0xa   : > { %p32_p0 = scmp.ge.s32.totalorder %s31_s12, 2  ;;  %p205_p1 = scmp.ne.s32.totalorder %s2959_s28, %s2955_s27 }
   0xb   : > { %p206_p2 = scmp.eq.s32.totalorder %s2280_s6, 3  ;;  %p211_p5 = scmp.ne.s32.totalorder %s2955_s27, %s2951_s26 }
   0xc   : > { %s3912_s12 = smov (%p32_p0, %s31_s12), 0  ;;  %s3914_s13 = smov (!%p32_p0, %s34_s13), %s2975_s9 }
   0xd   : > { %s191_s14 = ssub.s32 %s2971_s8, %s3912_s12  ;;  %p3086_p3 = por %p206_p2, %p205_p1 }
   0xe   : > { %p36_p4 = scmp.ge.s32.totalorder %s3914_s13, 2  ;;  %p212_p6 = scmp.eq.s32.totalorder %s2281_s11, 3 }
   0xf   : > { %p2284_p7 = scmp.ge.s32.totalorder %s2979_s10, 1  ;;  %p256_p9 = scmp.lt.s32.totalorder %s2979_s10, 5 }
  0x10   : > { %s3916_s13 = smov (%p36_p4, %s3914_s13), 0  ;;  %p3095_p8 = por %p212_p6, %p211_p5 }
  0x11   : > { %3901 = sst [smem:[#allocation7_spill]] %s3916_s13  ;;  %s190_s17 = ssub.s32 %s2975_s9, %s3916_s13 }
  0x12   : > { %s195_s18 = sadd.s32 1, %s2959_s28  ;;  %s192_s19 = sor.u32 %s191_s14, %s190_s17 }
  0x13   : > { %p257_p10 = pnand %p2284_p7, %p256_p9  ;;  %p193_p11 = scmp.eq.s32.totalorder %s192_s19, 0 }
  0x14   : > { %v295_v1 = vld [vmem:[%s3892_s1 + $0x8] sm:$0xff] (!%p257_p10)  ;;  %p288_p12 = scmp.lt.s32.totalorder (!%p257_p10), %s2967_s30, 1  ;;  %v312_v2 = vlaneseq (!%p257_p10)  ;;  %v2981_v3 = vmov (!%p257_p10), 0   ;;  %v298_v4 = vld [vmem:[%s3892_s1 + $0x20] sm:$0xff] (!%p257_p10)  ;;  %v2982_v5 = vmov (!%p257_p10), 1966171168  }
  0x15   : > { %s3104_s20 = scalar_select %p193_p11, %s2959_s28, %s195_s18  }
  0x16   : > { %260 = sbr.rel (%p257_p10) target bundleno = 991 (0x3df), region = 48  ;;  %2746 = vset.pattern.permute.xlu0 (!%p257_p10), %v2981_v3  ;;  %2747 = vset.pattern.permute.xlu1 (!%p257_p10), %v2981_v3  ;;  %v310_v6 = vunpack.c.l.s4 (!%p257_p10), %v2982_v5  ;;  %v296_v7 = vld [vmem:[%s3892_s1 + $0x10] sm:$0xff] (!%p257_p10)  ;;  %v299_v8 = vld [vmem:[%s3892_s1 + $0x28] sm:$0xff] (!%p257_p10)  ;;  %v313_v10 = vshrl.u32 (!%p257_p10), %v312_v2, 7  ;;  %s2287_s19 = sshll.u32 (!%p257_p10), %s2963_s29, 3  ;;  %v301_v11 = vld [vmem:[%s3892_s1 + $0x38] sm:$0xff] (!%p257_p10) }
  0x17   : > { %456 = vperm.xlu0 (!%p257_p10), %2746, %v295_v1   ;;  %738 = vperm.xlu1 (!%p257_p10), %2747, %v298_v4   ;;  %v302_v12 = vld [vmem:[%s3892_s1 + $0x40] sm:$0xff] (!%p257_p10)  ;;  %v297_v19 = vld [vmem:[%s3892_s1 + $0x18] sm:$0xff] (!%p257_p10)  ;;  %v300_v21 = vld [vmem:[%s3892_s1 + $0x30] sm:$0xff] (!%p257_p10)  ;;  %s2983_s24 = smov (!%p257_p10), 127   ;;  %s2984_s6 = smov (!%p257_p10), 126   ;;  %vm1214_vm0 = vcmask (!%p257_p10), 7168  }
  0x18   : > { %v311_v9 = vunpack.c.0.s8 (!%p257_p10), %v310_v6  ;;  %v294_v16 = vld [vmem:[%s3892_s1] sm:$0xff] (!%p257_p10)  ;;  %v3151_v22 = vsub.s32 (!%p257_p10), 0, %v313_v10  ;;  %s2985_s11 = smov (!%p257_p10), 1   ;;  %vm1225_vm1 = vcmask (!%p257_p10), 138240   ;;  %vm1236_vm2 = vcmask (!%p257_p10), 146432   ;;  %p2297_p13 = scmp.ne.s32.totalorder (!%p257_p10), %s2963_s29, 0 }
  0x19   : > { %v1148_v17 = vld [vmem:[%s3893_s2] sm:$0xff] (!%p257_p10) }
  0x1a   : > { %v3134_v13 = vsub.s32 (!%p257_p10), %v311_v9, %v313_v10 }
  0x1b   : > { %521 = vperm.xlu0 (!%p257_p10), %2746, %v296_v7   ;;  %803 = vperm.xlu1 (!%p257_p10), %2747, %v299_v8  }
  0x1d   : > { %s289_s25 = scalar_select %p288_p12, %s2967_s30, 1 }
  0x1f   : > { %s2664_s18 = smul.u32 24, %s289_s25  ;;  %1020 = vperm.xlu0 %2746, %v301_v11   ;;  %1085 = vperm.xlu1 %2747, %v302_v12  }
  0x21   : > { %s292_s23 = scalar_lea.vmem %s3891_s0, %s2664_s18 }
  0x22   : > { %s3132_s14 = scalar_lea.vmem %s292_s23, %s2287_s19 }
  0x23   : > { %v2294_v14 = vld [vmem:[%s3132_s14 + $0x2] sm:$0xff]  ;;  %381 = vperm.xlu0 %2746, %v294_v16   ;;  %1151 = vperm.xlu1 %2747, %v1148_v17   ;;  %v2296_v24 = vld.sshfl [vmem:[%s3132_s14 + $0xa] sm:$0x11 pattern:$0x75316420] }
  0x24   : > { %v879_v15 = vrot.slane %v2294_v14, %v3134_v13  ;;  %v872_v20 = vcombine.high %v2294_v14, %v2294_v14  ;;  %v935_v28 = vrot.slane %v2296_v24, %v3134_v13  ;;  %v928_v32 = vcombine.high %v2296_v24, %v2296_v24  ;;  %v304_v47 = vld [vmem:[%s3132_s14] sm:$0xff]  ;;  %v2288_v8 = vld.sshfl [vmem:[%s3132_s14 + $0x8] sm:$0x11 pattern:$0x75316420] }
  0x25   : > { %v315_v48 = vrot.slane %v304_v47, %v3134_v13  ;;  %v308_v50 = vcombine.high %v304_v47, %v304_v47  ;;  %v2290_v51 = vld [vmem:[%s3132_s14 + $0x1] sm:$0xff]  ;;  %v371_v11 = vrot.slane %v2288_v8, %v3134_v13  ;;  %v364_v14 = vcombine.high %v2288_v8, %v2288_v8  ;;  %v2292_v16 = vld.sshfl [vmem:[%s3132_s14 + $0x9] sm:$0x11 pattern:$0x75316420]  ;;  %s285_s14 = sand.u32 1, %s2955_s27  }
  0x26   : > { %v895_v18 = vrot.slane %v879_v15, %v3134_v13  ;;  %v886_v26 = vrot.slane %v872_v20, %v3134_v13  ;;  %v887_v27 = vcombine.high %v879_v15, %v879_v15  ;;  %v3165_v34 = vrot.slane %v935_v28, %v3151_v22  ;;  %s3546_s25 = sshll.u32 %s285_s14, 3 }
  0x27   : > { %663 = vperm.xlu0 %2746, %v297_v19   ;;  %v942_v38 = vrot.slane %v928_v32, %v3134_v13  ;;  %v323_v49 = vcombine.high %v315_v48, %v315_v48  ;;  %v331_v52 = vrot.slane %v315_v48, %v3134_v13  ;;  %v590_v54 = vcombine.high %v2290_v51, %v2290_v51  ;;  %s3586_s17 = scalar_lea.vmem [#allocation4], %s3546_s25 }
  0x28   : > { %v3154_v23 = vrot.slane %v895_v18, %v3151_v22  ;;  %v917_v25 = vcombine.high %v895_v18, %v895_v18  ;;  %v902_v30 = vrot.slane %v886_v26, %v3134_v13  ;;  %v888_v31 = vcombine.high %v886_v26, %v886_v26 }
  0x29   : > { %v909_v33 = vrot.slane %v887_v27, %v3134_v13  ;;  %v3182_v44 = vrot.slane %v942_v38, %v3151_v22  ;;  %v345_v53 = vrot.slane %v323_v49, %v3134_v13  ;;  %v322_v55 = vrot.slane %v308_v50, %v3134_v13 }
  0x2a   : > { %v3160_v29 = vrot.slane %v917_v25, %v3151_v22  ;;  %v3168_v35 = vrot.slane %v902_v30, %v3151_v22  ;;  %v918_v36 = vcombine.high %v902_v30, %v902_v30  ;;  %v916_v37 = vrot.slane %v888_v31, %v3134_v13 }
  0x2b   : > { %945 = vperm.xlu0 %2746, %v300_v21   ;;  %v3173_v39 = vrot.slane %v909_v33, %v3151_v22  ;;  %v919_v40 = vcombine.high %v909_v33, %v909_v33  ;;  %v353_v56 = vcombine.high %v331_v52, %v331_v52  ;;  %v597_v57 = vrot.slane %v2290_v51, %v3134_v13 }
  0x2c   : > { %v3176_v41 = vrot.slane %v918_v36, %v3151_v22  ;;  %v3179_v42 = vrot.slane %v916_v37, %v3151_v22  ;;  %v920_v43 = vcombine.high %v916_v37, %v916_v37  ;;  %v3198_v58 = vrot.slane %v331_v52, %v3151_v22 }
  0x2d   : > { %v3185_v45 = vrot.slane %v919_v40, %v3151_v22  ;;  %v3201_v59 = vrot.slane %v345_v53, %v3151_v22  ;;  %v355_v60 = vcombine.high %v345_v53, %v345_v53  ;;  %v338_v61 = vrot.slane %v322_v55, %v3134_v13 }
  0x2e   : > { %v3188_v46 = vrot.slane %v920_v43, %v3151_v22  ;;  %v604_v62 = vrot.slane %v590_v54, %v3134_v13  ;;  %v3208_v0 = vrot.slane %v353_v56, %v3151_v22  ;;  %v324_v1 = vcombine.high %v322_v55, %v322_v55 }
  0x2f   : > { %v605_v2 = vcombine.high %v597_v57, %v597_v57  ;;  %v3215_v6 = vrot.slane %v355_v60, %v3151_v22  ;;  %v354_v7 = vcombine.high %v338_v61, %v338_v61  ;;  %v3231_v19 = vrot.slane %v338_v61, %v3151_v22 }
  0x30   : > { %v606_v9 = vcombine.high %v604_v62, %v604_v62  ;;  %v352_v12 = vrot.slane %v324_v1, %v3134_v13  ;;  %v613_v24 = vrot.slane %v597_v57, %v3134_v13  ;;  %v646_v25 = vcombine.high %v2292_v16, %v2292_v16 }
  0x31   : > { %v627_v15 = vrot.slane %v605_v2, %v3134_v13  ;;  %v3234_v20 = vrot.slane %v354_v7, %v3151_v22  ;;  %v620_v26 = vrot.slane %v604_v62, %v3134_v13  ;;  %v3244_v28 = vrot.slane %v371_v11, %v3151_v22 }
  0x32   : > { %v634_v21 = vrot.slane %v606_v9, %v3134_v13  ;;  %v356_v30 = vcombine.high %v352_v12, %v352_v12  ;;  %v378_v31 = vrot.slane %v364_v14, %v3134_v13  ;;  %v407_v36 = vrot.slane %v352_v12, %v3151_v22 }
  0x33   : > { %v637_v37 = vcombine.high %v627_v15, %v627_v15  ;;  %v635_v40 = vcombine.high %v613_v24, %v613_v24  ;;  %v660_v43 = vrot.slane %v646_v25, %v3134_v13  ;;  %v636_v47 = vcombine.high %v620_v26, %v620_v26 }
  0x34   : > { %v638_v38 = vcombine.high %v634_v21, %v634_v21  ;;  %v653_v48 = vrot.slane %v2292_v16, %v3134_v13  ;;  %v415_v50 = vrot.slane %v356_v30, %v3151_v22  ;;  %v423_v51 = vrot.slane %v378_v31, %v3151_v22 }
  0x35   : > { %v3259_v52 = vrot.slane %v627_v15, %v3151_v22  ;;  %v3265_v55 = vrot.slane %v637_v37, %v3151_v22  ;;  %v3268_v56 = vrot.slane %v634_v21, %v3151_v22  ;;  %v3271_v13 = vrot.slane %v613_v24, %v3151_v22 }
  0x36   : > { %v3274_v57 = vrot.slane %v638_v38, %v3151_v22  ;;  %v3277_v60 = vrot.slane %v635_v40, %v3151_v22  ;;  %v3280_v61 = vrot.slane %v620_v26, %v3151_v22  ;;  %v3285_v62 = vrot.slane %v660_v43, %v3151_v22 }
  0x37   : > { %v3288_v1 = vrot.slane %v636_v47, %v3151_v22  ;;  %v3291_v2 = vrot.slane %v653_v48, %v3151_v22 }
  0x96   : > { %v3205_v63 = vpop.permute.xlu0 %456 }
  0x97   : > { %v459_v4 = vmul.f32 %v3205_v63, %v3198_v58  ;;  %v460_v5 = vmul.f32 %v3205_v63, %v3201_v59  ;;  %v461_v17 = vmul.f32 %v3205_v63, %v3208_v0  ;;  %v462_v18 = vmul.f32 %v3205_v63, %v3215_v6 }
  0x98   : > { %v463_v32 = vmul.f32 %v3205_v63, %v3231_v19  ;;  %v465_v33 = vmul.f32 %v3205_v63, %v3234_v20  ;;  %v467_v53 = vmul.f32 %v3205_v63, %v3244_v28  ;;  %v464_v54 = vmul.f32 %v3205_v63, %v407_v36 }
  0x99   : > { %479 = vrot.lane.b32.xlu1 %v459_v4, %s2983_s24  ;;  %481 = vrot.lane.b32.xlu0 %v460_v5, %s2983_s24  ;;  %v466_v5 = vmul.f32 %v3205_v63, %v415_v50  ;;  %v468_v7 = vmul.f32 %v3205_v63, %v423_v51 }
  0x9a   : > { %v3220_v10 = vpop.permute.xlu0 %521 }
  0x9b   : > { %v525_v11 = vmul.f32 %v3220_v10, %v3201_v59  ;;  %v527_v12 = vmul.f32 %v3220_v10, %v3215_v6  ;;  %v529_v40 = vmul.f32 %v3220_v10, %v407_v36  ;;  %v524_v43 = vmul.f32 %v3220_v10, %v3198_v58 }
  0x9c   : > { %v531_v47 = vmul.f32 %v3220_v10, %v415_v50  ;;  %v526_v48 = vmul.f32 %v3220_v10, %v3208_v0 }
  0x9d   : > { %483 = vrot.lane.b32.xlu1 %v461_v17, %s2983_s24  ;;  %485 = vrot.lane.b32.xlu0 %v462_v18, %s2983_s24 }
  0x9e   : > { %v3241_v27 = vpop.permute.xlu0 %1020 }
  0xa1   : > { %487 = vrot.lane.b32.xlu1 %v463_v32, %s2983_s24  ;;  %491 = vrot.lane.b32.xlu0 %v465_v33, %s2983_s24 }
  0xa2   : > { %v382_v49 = vpop.permute.xlu0 %381 }
  0xa3   : > { %v3296_v8 = vmul.f32 %v3198_v58, %v382_v49  ;;  %v3299_v9 = vmul.f32 %v3201_v59, %v382_v49  ;;  %v3306_v14 = vmul.f32 %v3208_v0, %v382_v49  ;;  %v3309_v15 = vmul.f32 %v3215_v6, %v382_v49 }
  0xa4   : > { %v3312_v63 = vmul.f32 %v3231_v19, %v382_v49  ;;  %v3315_v16 = vmul.f32 %v3234_v20, %v382_v49  ;;  %v3318_v17 = vmul.f32 %v3244_v28, %v382_v49  ;;  %v3320_v18 = vmul.f32 %v407_v36, %v382_v49 }
  0xa5   : > { %495 = vrot.lane.b32.xlu0 %v467_v53, %s2983_s24  ;;  %489 = vrot.lane.b32.xlu1 %v464_v54, %s2983_s24  ;;  %v3324_v59 = vmul.f32 %v415_v50, %v382_v49  ;;  %v3326_v6 = vmul.f32 %v423_v51, %v382_v49  ;;  %v533_v49 = vmul.f32 %v3220_v10, %v423_v51  ;;  %v739_v53 = vpop.permute.xlu1 %738 }
  0xa6   : > { %v664_v4 = vpop.permute.xlu0 %663  ;;  %v528_v36 = vmul.f32 %v3220_v10, %v3231_v19  ;;  %v742_v58 = vmul.f32 %v739_v53, %v3259_v52  ;;  %v530_v50 = vmul.f32 %v3220_v10, %v3234_v20  ;;  %v744_v0 = vmul.f32 %v739_v53, %v3265_v55 }
  0xa7   : > { %v3329_v21 = vmul.f32 %v3259_v52, %v664_v4  ;;  %v3332_v24 = vmul.f32 %v3265_v55, %v664_v4  ;;  %v3335_v25 = vmul.f32 %v3268_v56, %v664_v4  ;;  %v3338_v26 = vmul.f32 %v3271_v13, %v664_v4 }
  0xa8   : > { %v3341_v30 = vmul.f32 %v3274_v57, %v664_v4  ;;  %v3344_v31 = vmul.f32 %v3277_v60, %v664_v4  ;;  %v3347_v32 = vmul.f32 %v3285_v62, %v664_v4  ;;  %v3350_v33 = vmul.f32 %v3280_v61, %v664_v4 }
  0xa9   : > { %546 = vrot.lane.b32.xlu0 %v525_v11, %s2984_s6  ;;  %493 = vrot.lane.b32.xlu1 %v466_v5, %s2983_s24  ;;  %v3353_v37 = vmul.f32 %v3288_v1, %v664_v4  ;;  %v3356_v38 = vmul.f32 %v3291_v2, %v664_v4  ;;  %v532_v51 = vmul.f32 %v3220_v10, %v3244_v28  ;;  %v804_v5 = vpop.permute.xlu1 %803 }
  0xaa   : > { %v746_v19 = vmul.f32 %v739_v53, %v3268_v56  ;;  %v741_v54 = vmul.f32 %v739_v53, %v3271_v13  ;;  %v748_v20 = vmul.f32 %v739_v53, %v3274_v57  ;;  %v743_v4 = vmul.f32 %v739_v53, %v3277_v60 }
  0xab   : > { %v750_v10 = vmul.f32 %v739_v53, %v3285_v62  ;;  %v745_v28 = vmul.f32 %v739_v53, %v3280_v61  ;;  %v747_v11 = vmul.f32 %v739_v53, %v3288_v1 }
  0xad   : > { %550 = vrot.lane.b32.xlu0 %v527_v12, %s2984_s6  ;;  %497 = vrot.lane.b32.xlu1 %v468_v7, %s2983_s24  ;;  %v807_v7 = vmul.f32 %v804_v5, %v3259_v52  ;;  %v809_v12 = vmul.f32 %v804_v5, %v3265_v55  ;;  %v813_v52 = vmul.f32 %v804_v5, %v3274_v57 }
  0xae   : > { %v815_v55 = vmul.f32 %v804_v5, %v3285_v62  ;;  %v1025_v57 = vmul.f32 %v3241_v27, %v3160_v29  ;;  %v1024_v62 = vmul.f32 %v3241_v27, %v3173_v39 }
  0xb1   : > { %554 = vrot.lane.b32.xlu0 %v529_v40, %s2984_s6  ;;  %544 = vrot.lane.b32.xlu1 %v524_v43, %s2984_s6  ;;  %v749_v40 = vmul.f32 %v739_v53, %v3291_v2  ;;  %v811_v43 = vmul.f32 %v804_v5, %v3268_v56  ;;  %v1023_v56 = vmul.f32 %v3241_v27, %v3154_v23 }
  0xb2   : > { %v1028_v53 = vmul.f32 %v3241_v27, %v3179_v42 }
  0xb5   : > { %558 = vrot.lane.b32.xlu0 %v531_v47, %s2984_s6  ;;  %548 = vrot.lane.b32.xlu1 %v526_v48, %s2984_s6  ;;  %v806_v47 = vmul.f32 %v804_v5, %v3271_v13  ;;  %v808_v48 = vmul.f32 %v804_v5, %v3277_v60  ;;  %v812_v13 = vmul.f32 %v804_v5, %v3288_v1 }
  0xb6   : > { %v814_v60 = vmul.f32 %v804_v5, %v3291_v2  ;;  %v1029_v1 = vmul.f32 %v3241_v27, %v3176_v41  ;;  %v1026_v2 = vmul.f32 %v3241_v27, %v3185_v45 }
  0xb9   : > { %562 = vrot.lane.b32.xlu0 %v533_v49, %s2984_s6  ;;  %552 = vrot.lane.b32.xlu1 %v528_v36, %s2984_s6  ;;  %v810_v49 = vmul.f32 %v804_v5, %v3280_v61  ;;  %v1027_v61 = vmul.f32 %v3241_v27, %v3168_v35  ;;  %v1031_v36 = vmul.f32 %v3241_v27, %v3165_v34 }
  0xbd   : > { %763 = vrot.lane.b32.xlu0 %v742_v58, %s2983_s24  ;;  %556 = vrot.lane.b32.xlu1 %v530_v50, %s2984_s6  ;;  %v1086_v58 = vpop.permute.xlu1 %1085 }
  0xbe   : > { %v1088_v50 = vmul.f32 %v1086_v58, %v3154_v23  ;;  %v1096_v5 = vmul.f32 %v1086_v58, %v3165_v34 }
  0xc1   : > { %767 = vrot.lane.b32.xlu0 %v744_v0, %s2983_s24  ;;  %560 = vrot.lane.b32.xlu1 %v532_v51, %s2984_s6  ;;  %v1030_v0 = vmul.f32 %v3241_v27, %v3188_v46  ;;  %v1090_v51 = vmul.f32 %v1086_v58, %v3160_v29 }
  0xc5   : > { %771 = vrot.lane.b32.xlu0 %v746_v19, %s2983_s24  ;;  %761 = vrot.lane.b32.xlu1 %v741_v54, %s2983_s24  ;;  %v1032_v19 = vmul.f32 %v3241_v27, %v3182_v44  ;;  %v1092_v54 = vmul.f32 %v1086_v58, %v3168_v35  ;;  %v3463_v27 = vpop.permute.xlu0 %945 }
  0xc9   : > { %775 = vrot.lane.b32.xlu0 %v748_v20, %s2983_s24  ;;  %765 = vrot.lane.b32.xlu1 %v743_v4, %s2983_s24  ;;  %v1089_v20 = vmul.f32 %v1086_v58, %v3173_v39  ;;  %v1094_v4 = vmul.f32 %v1086_v58, %v3176_v41 }
  0xcd   : > { %779 = vrot.lane.b32.xlu0 %v750_v10, %s2983_s24  ;;  %769 = vrot.lane.b32.xlu1 %v745_v28, %s2983_s24  ;;  %v1091_v10 = vmul.f32 %v1086_v58, %v3185_v45  ;;  %v3465_v28 = vpop.permute.xlu1 %1151 }
  0xd1   : > { %828 = vrot.lane.b32.xlu0 %v807_v7, %s2984_s6  ;;  %773 = vrot.lane.b32.xlu1 %v747_v11, %s2983_s24  ;;  %v1093_v7 = vmul.f32 %v1086_v58, %v3179_v42 }
  0xd5   : > { %832 = vrot.lane.b32.xlu0 %v809_v12, %s2984_s6  ;;  %777 = vrot.lane.b32.xlu1 %v749_v40, %s2983_s24  ;;  %v1095_v40 = vmul.f32 %v1086_v58, %v3188_v46 }
  0xd9   : > { %836 = vrot.lane.b32.xlu0 %v811_v43, %s2984_s6  ;;  %826 = vrot.lane.b32.xlu1 %v806_v47, %s2984_s6 }
  0xdd   : > { %840 = vrot.lane.b32.xlu0 %v813_v52, %s2984_s6  ;;  %830 = vrot.lane.b32.xlu1 %v808_v48, %s2984_s6 }
  0xe1   : > { %844 = vrot.lane.b32.xlu0 %v815_v55, %s2984_s6  ;;  %834 = vrot.lane.b32.xlu1 %v810_v49, %s2984_s6  ;;  %v1097_v55 = vmul.f32 %v1086_v58, %v3182_v44 }
  0xe5   : > { %1043 = vrot.lane.b32.xlu0 %v1023_v56, %s2983_s24  ;;  %838 = vrot.lane.b32.xlu1 %v812_v13, %s2984_s6 }
  0xe9   : > { %1047 = vrot.lane.b32.xlu0 %v1025_v57, %s2983_s24  ;;  %842 = vrot.lane.b32.xlu1 %v814_v60, %s2984_s6 }
  0xed   : > { %1051 = vrot.lane.b32.xlu0 %v1027_v61, %s2983_s24  ;;  %1045 = vrot.lane.b32.xlu1 %v1024_v62, %s2983_s24 }
  0xf1   : > { %1055 = vrot.lane.b32.xlu0 %v1029_v1, %s2983_s24  ;;  %1049 = vrot.lane.b32.xlu1 %v1026_v2, %s2983_s24 }
  0xf5   : > { %1059 = vrot.lane.b32.xlu0 %v1031_v36, %s2983_s24  ;;  %1053 = vrot.lane.b32.xlu1 %v1028_v53, %s2983_s24 }
  0xf9   : > { %1108 = vrot.lane.b32.xlu0 %v1088_v50, %s2984_s6  ;;  %1057 = vrot.lane.b32.xlu1 %v1030_v0, %s2983_s24 }
  0xfd   : > { %1112 = vrot.lane.b32.xlu0 %v1090_v51, %s2984_s6  ;;  %1061 = vrot.lane.b32.xlu1 %v1032_v19, %s2983_s24 }
 0x101   : > { %1116 = vrot.lane.b32.xlu0 %v1092_v54, %s2984_s6  ;;  %1110 = vrot.lane.b32.xlu1 %v1089_v20, %s2984_s6 }
 0x105   : > { %1120 = vrot.lane.b32.xlu0 %v1094_v4, %s2984_s6  ;;  %1114 = vrot.lane.b32.xlu1 %v1091_v10, %s2984_s6 }
 0x109   : > { %1124 = vrot.lane.b32.xlu0 %v1096_v5, %s2984_s6  ;;  %1118 = vrot.lane.b32.xlu1 %v1093_v7, %s2984_s6 }
 0x10b   : > { %v480_v11 = vpop.permute.xlu1 %479  ;;  %v482_v12 = vpop.permute.xlu0 %481 }
 0x10c   : > { %v509_v43 = vadd.f32 %v480_v11, %v3296_v8  ;;  %v510_v47 = vadd.f32 %v482_v12, %v3299_v9 }
 0x10d   : > { %1122 = vrot.lane.b32.xlu1 %v1095_v40, %s2984_s6 }
 0x10f   : > { %v484_v52 = vpop.permute.xlu1 %483  ;;  %v486_v48 = vpop.permute.xlu0 %485 }
 0x110   : > { %v511_v49 = vadd.f32 %v484_v52, %v3306_v14  ;;  %v512_v56 = vadd.f32 %v486_v48, %v3309_v15 }
 0x111   : > { %1126 = vrot.lane.b32.xlu1 %v1097_v55, %s2984_s6 }
 0x113   : > { %v488_v13 = vpop.permute.xlu1 %487  ;;  %v492_v57 = vpop.permute.xlu0 %491 }
 0x114   : > { %v513_v60 = vadd.f32 %v488_v13, %v3312_v63  ;;  %v515_v8 = vadd.f32 %v492_v57, %v3315_v16 }
 0x117   : > { %v496_v61 = vpop.permute.xlu0 %495  ;;  %v490_v9 = vpop.permute.xlu1 %489 }
 0x118   : > { %v517_v62 = vadd.f32 %v496_v61, %v3318_v17  ;;  %v514_v1 = vadd.f32 %v490_v9, %v3320_v18 }
 0x11b   : > { %v547_v2 = vpop.permute.xlu0 %546  ;;  %v494_v36 = vpop.permute.xlu1 %493 }
 0x11c   : > { %v575_v53 = vadd.f32 %v547_v2, %v510_v47  ;;  %v516_v14 = vadd.f32 %v494_v36, %v3324_v59 }
 0x11e   : > { %v727_v15 = vadd.f32 %v3329_v21, %v575_v53 }
 0x11f   : > { %v551_v58 = vpop.permute.xlu0 %550  ;;  %v498_v50 = vpop.permute.xlu1 %497 }
 0x120   : > { %v577_v0 = vadd.f32 %v551_v58, %v512_v56  ;;  %v518_v63 = vadd.f32 %v498_v50, %v3326_v6 }
 0x122   : > { %v729_v16 = vadd.f32 %v3332_v24, %v577_v0 }
 0x123   : > { %v555_v51 = vpop.permute.xlu0 %554  ;;  %v545_v19 = vpop.permute.xlu1 %544 }
 0x124   : > { %v579_v54 = vadd.f32 %v555_v51, %v514_v1  ;;  %v574_v17 = vadd.f32 %v545_v19, %v509_v43 }
 0x126   : > { %v731_v18 = vadd.f32 %v3335_v25, %v579_v54  ;;  %v726_v20 = vadd.f32 %v3338_v26, %v574_v17 }
 0x127   : > { %v559_v4 = vpop.permute.xlu0 %558  ;;  %v549_v10 = vpop.permute.xlu1 %548 }
 0x128   : > { %v581_v59 = vadd.f32 %v559_v4, %v516_v14  ;;  %v576_v5 = vadd.f32 %v549_v10, %v511_v49 }
 0x12a   : > { %v733_v21 = vadd.f32 %v3341_v30, %v581_v59  ;;  %v728_v7 = vadd.f32 %v3344_v31, %v576_v5  ;;  %v1000_v59 = vmul.f32 %v3160_v29, %v3463_v27  ;;  %v1005_v5 = vmul.f32 %v3188_v46, %v3463_v27 }
 0x12b   : > { %v563_v11 = vpop.permute.xlu0 %562  ;;  %v553_v6 = vpop.permute.xlu1 %552 }
 0x12c   : > { %v583_v12 = vadd.f32 %v563_v11, %v518_v63  ;;  %v578_v24 = vadd.f32 %v553_v6, %v513_v60 }
 0x12e   : > { %v735_v40 = vadd.f32 %v3347_v32, %v583_v12  ;;  %v730_v43 = vadd.f32 %v3350_v33, %v578_v24 }
 0x12f   : > { %v764_v47 = vpop.permute.xlu0 %763  ;;  %v557_v25 = vpop.permute.xlu1 %556 }
 0x130   : > { %v580_v52 = vadd.f32 %v557_v25, %v515_v8  ;;  %v792_v9 = vadd.f32 %v764_v47, %v727_v15  ;;  %v999_v8 = vmul.f32 %v3173_v39, %v3463_v27  ;;  %v998_v39 = vmul.f32 %v3154_v23, %v3463_v27 }
 0x131   : > { %v1002_v47 = vmul.f32 %v3168_v35, %v3463_v27  ;;  %v1007_v25 = vmul.f32 %v3182_v44, %v3463_v27  ;;  %v1006_v35 = vmul.f32 %v3165_v34, %v3463_v27 }
 0x132   : > { %v732_v26 = vadd.f32 %v3353_v37, %v580_v52 }
 0x133   : > { %v768_v48 = vpop.permute.xlu0 %767  ;;  %v561_v55 = vpop.permute.xlu1 %560 }
 0x134   : > { %v582_v49 = vadd.f32 %v561_v55, %v517_v62  ;;  %v794_v2 = vadd.f32 %v768_v48, %v729_v16  ;;  %v1003_v16 = vmul.f32 %v3179_v42, %v3463_v27  ;;  %v1004_v55 = vmul.f32 %v3176_v41, %v3463_v27 }
 0x136   : > { %v734_v30 = vadd.f32 %v3356_v38, %v582_v49  ;;  %v1001_v38 = vmul.f32 %v3185_v45, %v3463_v27 }
 0x137   : > { %v772_v56 = vpop.permute.xlu0 %771  ;;  %v762_v31 = vpop.permute.xlu1 %761 }
 0x138   : > { %v796_v14 = vadd.f32 %v772_v56, %v731_v18  ;;  %v791_v58 = vadd.f32 %v762_v31, %v726_v20 }
 0x13b   : > { %v776_v13 = vpop.permute.xlu0 %775  ;;  %v766_v57 = vpop.permute.xlu1 %765 }
 0x13c   : > { %v798_v19 = vadd.f32 %v776_v13, %v733_v21  ;;  %v793_v54 = vadd.f32 %v766_v57, %v728_v7 }
 0x13f   : > { %v780_v61 = vpop.permute.xlu0 %779  ;;  %v770_v60 = vpop.permute.xlu1 %769 }
 0x140   : > { %v800_v11 = vadd.f32 %v780_v61, %v735_v40  ;;  %v795_v23 = vadd.f32 %v770_v60, %v730_v43 }
 0x143   : > { %v829_v32 = vpop.permute.xlu0 %828  ;;  %v774_v1 = vpop.permute.xlu1 %773 }
 0x144   : > { %v857_v33 = vadd.f32 %v829_v32, %v792_v9  ;;  %v797_v52 = vadd.f32 %v774_v1, %v732_v26 }
 0x146   : > { %v3497_v37 = vadd.f32 %v999_v8, %v857_v33 }
 0x147   : > { %v833_v36 = vpop.permute.xlu0 %832  ;;  %v778_v62 = vpop.permute.xlu1 %777 }
 0x148   : > { %v859_v53 = vadd.f32 %v833_v36, %v794_v2  ;;  %v799_v49 = vadd.f32 %v778_v62, %v734_v30 }
 0x14a   : > { %v3501_v50 = vadd.f32 %v1001_v38, %v859_v53 }
 0x14b   : > { %v837_v15 = vpop.permute.xlu0 %836  ;;  %v827_v0 = vpop.permute.xlu1 %826 }
 0x14c   : > { %v861_v63 = vadd.f32 %v837_v15, %v796_v14  ;;  %v856_v51 = vadd.f32 %v827_v0, %v791_v58 }
 0x14e   : > { %v1008_v17 = vadd.f32 %v998_v39, %v856_v51  ;;  %v3507_v4 = vadd.f32 %v1003_v16, %v861_v63 }
 0x14f   : > { %v841_v45 = vpop.permute.xlu0 %840  ;;  %v831_v18 = vpop.permute.xlu1 %830 }
 0x150   : > { %v863_v20 = vadd.f32 %v841_v45, %v798_v19  ;;  %v858_v10 = vadd.f32 %v831_v18, %v793_v54 }
 0x152   : > { %v1010_v6 = vadd.f32 %v1000_v59, %v858_v10  ;;  %v3513_v12 = vadd.f32 %v1005_v5, %v863_v20 }
 0x153   : > { %v845_v42 = vpop.permute.xlu0 %844  ;;  %v835_v21 = vpop.permute.xlu1 %834 }
 0x154   : > { %v865_v7 = vadd.f32 %v845_v42, %v800_v11  ;;  %v860_v24 = vadd.f32 %v835_v21, %v795_v23 }
 0x156   : > { %v1012_v29 = vadd.f32 %v1002_v47, %v860_v24  ;;  %v3519_v48 = vadd.f32 %v1007_v25, %v865_v7 }
 0x157   : > { %v1044_v46 = vpop.permute.xlu0 %1043  ;;  %v839_v40 = vpop.permute.xlu1 %838 }
 0x158   : > { %v862_v43 = vadd.f32 %v839_v40, %v797_v52  ;;  %v1073_v33 = vadd.f32 %v1044_v46, %v1008_v17 }
 0x15a   : > { %v1014_v56 = vadd.f32 %v1004_v55, %v862_v43 }
 0x15b   : > { %v1048_v31 = vpop.permute.xlu0 %1047  ;;  %v843_v13 = vpop.permute.xlu1 %842 }
 0x15c   : > { %v864_v57 = vadd.f32 %v843_v13, %v799_v49  ;;  %v1075_v41 = vadd.f32 %v1048_v31, %v1010_v6 }
 0x15e   : > { %v1016_v61 = vadd.f32 %v1006_v35, %v864_v57 }
 0x15f   : > { %v1052_v44 = vpop.permute.xlu0 %1051  ;;  %v1046_v26 = vpop.permute.xlu1 %1045 }
 0x160   : > { %v1077_v58 = vadd.f32 %v1052_v44, %v1012_v29  ;;  %v1074_v34 = vadd.f32 %v1046_v26, %v3497_v37 }
 0x163   : > { %v1056_v60 = vpop.permute.xlu0 %1055  ;;  %v1050_v9 = vpop.permute.xlu1 %1049 }
 0x164   : > { %v1079_v16 = vadd.f32 %v1056_v60, %v1014_v56  ;;  %v1076_v19 = vadd.f32 %v1050_v9, %v3501_v50 }
 0x167   : > { %v1060_v32 = vpop.permute.xlu0 %1059  ;;  %v1054_v1 = vpop.permute.xlu1 %1053 }
 0x168   : > { %v1081_v5 = vadd.f32 %v1060_v32, %v1016_v61  ;;  %v1078_v11 = vadd.f32 %v1054_v1, %v3507_v4 }
 0x16b   : > { %v1109_v8 = vpop.permute.xlu0 %1108  ;;  %v1058_v2 = vpop.permute.xlu1 %1057 }
 0x16c   : > { %v1138_v36 = vadd.f32 %v1109_v8, %v1073_v33  ;;  %v1080_v25 = vadd.f32 %v1058_v2, %v3513_v12 }
 0x16e   : > { %v1154_v30 = vadd.f32 %v3465_v28, %v1138_v36 }
 0x16f   : > { %v1113_v62 = vpop.permute.xlu0 %1112  ;;  %v1062_v53 = vpop.permute.xlu1 %1061 }
 0x170   : > { %v1164_v38 = vmax.f32 %v1154_v30, 0.0  ;;  %v1140_v14 = vadd.f32 %v1113_v62, %v1075_v41  ;;  %v1082_v55 = vadd.f32 %v1062_v53, %v3519_v48 }
 0x172   : > { %v1156_v27 = vadd.f32 %v3465_v28, %v1140_v14  ;;  %1184 = vrot.lane.b32.xlu0 %v1164_v38, %s2985_s11 }
 0x173   : > { %v1117_v15 = vpop.permute.xlu0 %1116  ;;  %v1111_v0 = vpop.permute.xlu1 %1110 }
 0x174   : > { %v1166_v63 = vmax.f32 %v1156_v27, 0.0  ;;  %v1142_v51 = vadd.f32 %v1117_v15, %v1077_v58  ;;  %v1139_v39 = vadd.f32 %v1111_v0, %v1074_v34 }
 0x176   : > { %v1158_v54 = vadd.f32 %v3465_v28, %v1142_v51  ;;  %v1155_v17 = vadd.f32 %v3465_v28, %v1139_v39  ;;  %1188 = vrot.lane.b32.xlu0 %v1166_v63, %s2985_s11 }
 0x177   : > { %v1121_v37 = vpop.permute.xlu0 %1120  ;;  %v1115_v45 = vpop.permute.xlu1 %1114 }
 0x178   : > { %v1168_v18 = vmax.f32 %v1158_v54, 0.0  ;;  %v1165_v20 = vmax.f32 %v1155_v17, 0.0  ;;  %v1144_v10 = vadd.f32 %v1121_v37, %v1079_v16  ;;  %v1141_v59 = vadd.f32 %v1115_v45, %v1076_v19 }
 0x179   : > { %v2986_v54 = vmov (!%p2297_p13), 0.0  }
 0x17a   : > { %v1160_v23 = vadd.f32 %v3465_v28, %v1144_v10  ;;  %v1157_v50 = vadd.f32 %v3465_v28, %v1141_v59  ;;  %1192 = vrot.lane.b32.xlu0 %v1168_v18, %s2985_s11  ;;  %1186 = vrot.lane.b32.xlu1 %v1165_v20, %s2985_s11 }
 0x17b   : > { %v1125_v6 = vpop.permute.xlu0 %1124  ;;  %v1119_v42 = vpop.permute.xlu1 %1118 }
 0x17c   : > { %v1170_v21 = vmax.f32 %v1160_v23, 0.0  ;;  %v1167_v7 = vmax.f32 %v1157_v50, 0.0  ;;  %v1146_v24 = vadd.f32 %v1125_v6, %v1081_v5  ;;  %v1143_v47 = vadd.f32 %v1119_v42, %v1078_v11 }
 0x17e   : > { %v1162_v4 = vadd.f32 %v3465_v28, %v1146_v24  ;;  %v1159_v52 = vadd.f32 %v3465_v28, %v1143_v47  ;;  %1196 = vrot.lane.b32.xlu0 %v1170_v21, %s2985_s11  ;;  %1190 = vrot.lane.b32.xlu1 %v1167_v7, %s2985_s11 }
 0x17f   : > { %v1123_v29 = vpop.permute.xlu1 %1122 }
 0x180   : > { %v1172_v46 = vmax.f32 %v1162_v4, 0.0  ;;  %v1169_v40 = vmax.f32 %v1159_v52, 0.0  ;;  %v1145_v43 = vadd.f32 %v1123_v29, %v1080_v25 }
 0x182   : > { %v1161_v12 = vadd.f32 %v3465_v28, %v1145_v43  ;;  %1200 = vrot.lane.b32.xlu0 %v1172_v46, %s2985_s11  ;;  %1194 = vrot.lane.b32.xlu1 %v1169_v40, %s2985_s11 }
 0x183   : > { %v1127_v49 = vpop.permute.xlu1 %1126 }
 0x184   : > { %v1171_v56 = vmax.f32 %v1161_v12, 0.0  ;;  %v1147_v31 = vadd.f32 %v1127_v49, %v1082_v55 }
 0x186   : > { %v1163_v13 = vadd.f32 %v3465_v28, %v1147_v31  ;;  %1198 = vrot.lane.b32.xlu1 %v1171_v56, %s2985_s11 }
 0x188   : > { %v1173_v57 = vmax.f32 %v1163_v13, 0.0 }
 0x18a   : > { %1202 = vrot.lane.b32.xlu1 %v1173_v57, %s2985_s11 }
 0x1e4   : > { %v1185_v48 = vpop.permute.xlu0 %1184 }
 0x1e5   : > { %v1215_v35 = vsel %vm1214_vm0, 0.0, %v1185_v48 }
 0x1e6   : > { %v1226_v61 = vsel %vm1225_vm1, %v1215_v35, 0.0 }
 0x1e7   : > { %1237 = vst.msk [vmem:[#allocation2] sm:$0xff] %vm1236_vm2, %v1226_v61 }
 0x1e8   : > { %v1189_v44 = vpop.permute.xlu0 %1188  ;;  %1251 = vst.msk [vmem:[#allocation2] sm:$0xff] (!%p2297_p13), %vm1236_vm2, %v2986_v54 }
 0x1e9   : > { %v1217_v26 = vsel %vm1214_vm0, 0.0, %v1189_v44 }
 0x1ea   : > { %v1228_v28 = vsel %vm1225_vm1, %v1217_v26, 0.0 }
 0x1eb   : > { %1239 = vst.msk [vmem:[#allocation2 + $0x10] sm:$0xff] %vm1236_vm2, %v1228_v28 }
 0x1ec   : > { %v1193_v60 = vpop.permute.xlu0 %1192  ;;  %v1187_v9 = vpop.permute.xlu1 %1186 }
 0x1ed   : > { %v1219_v32 = vsel %vm1214_vm0, 0.0, %v1193_v60  ;;  %v1216_v1 = vsel %vm1214_vm0, 0.0, %v1187_v9 }
 0x1ee   : > { %v1230_v33 = vsel %vm1225_vm1, %v1219_v32, 0.0  ;;  %v1227_v8 = vsel %vm1225_vm1, %v1216_v1, 0.0 }
 0x1ef   : > { %1241 = vst.msk [vmem:[#allocation2 + $0x20] sm:$0xff] %vm1236_vm2, %v1230_v33  ;;  %1238 = vst.msk [vmem:[#allocation2 + $0x8] sm:$0xff] %vm1236_vm2, %v1227_v8 }
 0x1f0   : > { %v1197_v2 = vpop.permute.xlu0 %1196  ;;  %v1191_v36 = vpop.permute.xlu1 %1190 }
 0x1f1   : > { %v1221_v41 = vsel %vm1214_vm0, 0.0, %v1197_v2  ;;  %v1218_v30 = vsel %vm1214_vm0, 0.0, %v1191_v36 }
 0x1f2   : > { %v1232_v62 = vsel %vm1225_vm1, %v1221_v41, 0.0  ;;  %v1229_v53 = vsel %vm1225_vm1, %v1218_v30, 0.0 }
 0x1f3   : > { %1243 = vst.msk [vmem:[#allocation2 + $0x30] sm:$0xff] %vm1236_vm2, %v1232_v62  ;;  %1240 = vst.msk [vmem:[#allocation2 + $0x18] sm:$0xff] %vm1236_vm2, %v1229_v53 }
 0x1f4   : > { %v1201_v38 = vpop.permute.xlu0 %1200  ;;  %v1195_v14 = vpop.permute.xlu1 %1194 }
 0x1f5   : > { %v1223_v58 = vsel %vm1214_vm0, 0.0, %v1201_v38  ;;  %v1220_v34 = vsel %vm1214_vm0, 0.0, %v1195_v14 }
 0x1f6   : > { %v1234_v27 = vsel %vm1225_vm1, %v1223_v58, 0.0  ;;  %v1231_v15 = vsel %vm1225_vm1, %v1220_v34, 0.0 }
 0x1f7   : > { %1245 = vst.msk [vmem:[#allocation2 + $0x40] sm:$0xff] %vm1236_vm2, %v1234_v27  ;;  %1242 = vst.msk [vmem:[#allocation2 + $0x28] sm:$0xff] %vm1236_vm2, %v1231_v15 }
 0x1f8   : > { %v1199_v0 = vpop.permute.xlu1 %1198 }
 0x1f9   : > { %v1222_v63 = vsel %vm1214_vm0, 0.0, %v1199_v0  ;;  %1250 = sbr.rel (%p2297_p13) target bundleno = 512 (0x200), region = 52 }
 0x1fa   : > { %v1233_v51 = vsel %vm1225_vm1, %v1222_v63, 0.0 }
 0x1fb   : > { %1244 = vst.msk [vmem:[#allocation2 + $0x38] sm:$0xff] %vm1236_vm2, %v1233_v51 }
 0x1fc   : > { %v1203_v39 = vpop.permute.xlu1 %1202 }
 0x1fd   : > { %v1224_v16 = vsel %vm1214_vm0, 0.0, %v1203_v39 }
 0x1fe   : > { %v1235_v19 = vsel %vm1225_vm1, %v1224_v16, 0.0 }
 0x1ff   : > { %1246 = vst.msk [vmem:[#allocation2 + $0x48] sm:$0xff] %vm1236_vm2, %v1235_v19 }
 0x200 PF: > { %p2298_p0 = scmp.ne.s32.totalorder %s2963_s29, 1 }
 0x201   : > { %v2987_v17 = vmov (!%p2298_p0), 0.0  }
 0x202   : > { %1255 = sbr.rel (%p2298_p0) target bundleno = 521 (0x209), region = 56  ;;  %1257 = vst.msk [vmem:[#allocation2 + $0x48] sm:$0xff] (!%p2298_p0), %vm1236_vm2, %v2987_v17 }
 0x209 PF: > { %v3592_v37 = vld [vmem:[#allocation2 + $0x8] sm:$0xff]  ;;  %v3594_v45 = vld [vmem:[#allocation2 + $0x10] sm:$0xff]  ;;  %v3596_v18 = vld [vmem:[#allocation2] sm:$0xff]  ;;  %2851 = vset.pattern.permute.xlu0 %v2981_v3  ;;  %2852 = vset.pattern.permute.xlu1 %v2981_v3  ;;  %v2988_v59 = vmov 0.0|0.0   ;;  %vm2989_vm3 = vmmov 0   ;;  %v2990_v11 = vmov 0.0  }
 0x20a   : > { %v2761_v20 = vpack.i.bf16 %v3594_v45, %v3592_v37  ;;  %v2751_v10 = vpack.i.bf16 %v3592_v37, %v3596_v18  ;;  %2568 = vmatprep.subr.bf16.mxu0 %v2988_v59  ;;  %2580 = vmatprep.subr.bf16.mxu1 %v2988_v59  ;;  %v3608_v5 = vld [vmem:[#allocation2 + $0x18] sm:$0xff]  ;;  %v3621_v23 = vld [vmem:[#allocation2 + $0x20] sm:$0xff]  ;;  %v3628_v6 = vld [vmem:[#allocation2 + $0x28] sm:$0xff]  ;;  %vm1293_vm4 = vcmask 588800   ;;  %vm1374_vm5 = vcmask 130048   ;;  %s2200_s25 = sshll.u32 %s3586_s17, 4  ;;  %s3834_s25 = int_to_ptr.vmem [resolvable:$true] %s2200_s25 }
 0x20b   : > { %v2771_v3 = vpack.i.bf16 %v3608_v5, %v3594_v45  ;;  %2418 = vmatprep.mubr.msk.f32.mxu0 %vm2989_vm3, %v2990_v11  ;;  %2439 = vmatprep.mubr.msk.f32.mxu1 %vm2989_vm3, %v2990_v11  ;;  %v2786_v50 = vpack.i.bf16 %v3621_v23, %v3608_v5  ;;  %v2796_v42 = vpack.i.bf16 %v3628_v6, %v3621_v23  ;;  %v3640_v21 = vld [vmem:[#allocation2 + $0x30] sm:$0xff]  ;;  %v3646_v24 = vld [vmem:[#allocation2 + $0x38] sm:$0xff]  ;;  %v3655_v25 = vld [vmem:[#allocation2 + $0x40] sm:$0xff]  ;;  %vm1398_vm6 = vcmask 122880   ;;  %s2991_s21 = smov [#allocation4]  }
 0x20c   : > { %2762 = vrot.lane.b32.xlu1 %v2761_v20, %s2983_s24  ;;  %2752 = vrot.lane.b32.xlu0 %v2751_v10, %s2983_s24  ;;  %v2816_v7 = vpack.i.bf16 %v3640_v21, %v3628_v6  ;;  %v2821_v47 = vpack.i.bf16 %v3646_v24, %v3640_v21  ;;  %v2836_v4 = vpack.i.bf16 %v3655_v25, %v3646_v24  ;;  %v3662_v52 = vld [vmem:[#allocation2 + $0x48] sm:$0xff]  ;;  %v1259_v46 = vld [vmem:[%s3895_s4] sm:$0xff]  ;;  %v1261_v43 = vld [vmem:[#allocation3] sm:$0x1]  ;;  %s2889_s22 = sshll.u32 %s2991_s21, 4  ;;  %s2890_s22 = int_to_ptr.vmem [resolvable:$false] %s2889_s22 }
 0x20d   : > { %v2846_v29 = vpack.i.bf16 %v3662_v52, %v3655_v25  ;;  %v1260_v40 = vld [vmem:[%s3896_s5] sm:$0xff]  ;;  %s2891_s23 = scalar_lea.vmem %s2890_s22, 256  ;;  %p2892_p5 = scmp.lt.s32.totalorder %s3834_s25, %s2890_s22 }
 0x20e   : > { %v3697_v15 = vld [vmem:[%s3894_s3] sm:$0xff] }
 0x210   : > { %2767 = vrot.lane.b32.xlu1 %v2761_v20, %s2984_s6  ;;  %2757 = vrot.lane.b32.xlu0 %v2751_v10, %s2984_s6 }
 0x214   : > { %2772 = vrot.lane.b32.xlu0 %v2771_v3, %s2983_s24  ;;  %1285 = vrot.lane.b32.xlu1 %v3594_v45, %s2984_s6 }
 0x218   : > { %2777 = vrot.lane.b32.xlu1 %v2771_v3, %s2983_s24  ;;  %1422 = vrot.lane.b32.xlu0 %v3608_v5, %s2984_s6 }
 0x21c   : > { %2782 = vrot.lane.b32.xlu0 %v2771_v3, %s2984_s6  ;;  %2787 = vrot.lane.b32.xlu1 %v2786_v50, %s2983_s24 }
 0x220   : > { %2792 = vrot.lane.b32.xlu0 %v2786_v50, %s2984_s6  ;;  %2797 = vrot.lane.b32.xlu1 %v2796_v42, %s2983_s24 }
 0x224   : > { %1534 = vrot.lane.b32.xlu0 %v3621_v23, %s2984_s6  ;;  %1646 = vrot.lane.b32.xlu1 %v3628_v6, %s2984_s6 }
 0x228   : > { %2802 = vrot.lane.b32.xlu0 %v2796_v42, %s2983_s24  ;;  %2807 = vrot.lane.b32.xlu1 %v2796_v42, %s2984_s6 }
 0x22c   : > { %2817 = vrot.lane.b32.xlu1 %v2816_v7, %s2984_s6  ;;  %2812 = vrot.lane.b32.xlu0 %v2816_v7, %s2983_s24 }
 0x230   : > { %2822 = vrot.lane.b32.xlu0 %v2821_v47, %s2983_s24  ;;  %1758 = vrot.lane.b32.xlu1 %v3640_v21, %s2984_s6 }
 0x234   : > { %2827 = vrot.lane.b32.xlu1 %v2821_v47, %s2983_s24  ;;  %1870 = vrot.lane.b32.xlu0 %v3646_v24, %s2984_s6 }
 0x238   : > { %2832 = vrot.lane.b32.xlu0 %v2821_v47, %s2984_s6  ;;  %2837 = vrot.lane.b32.xlu1 %v2836_v4, %s2983_s24 }
 0x23c   : > { %2842 = vrot.lane.b32.xlu0 %v2836_v4, %s2984_s6  ;;  %2847 = vrot.lane.b32.xlu1 %v2846_v29, %s2983_s24  ;;  %s2316_s24 = sshll.u32 %s2967_s30, 1  ;;  %s2885_s30 = scalar_lea.vmem %s3834_s25, 128 }
 0x23d   : > { %p2886_p1 = scmp.ne.s32.totalorder %s3834_s25, %s2885_s30  ;;  %p2893_p6 = scmp.lt.s32.totalorder %s2891_s23, %s2885_s30 }
 0x23f   : > { %p2887_p2 = pnand %p2886_p1, %p3086_p3  ;;  %p2894_p7 = por %p2893_p6, %p2892_p5 }
 0x240   : > { %2094 = vrot.lane.b32.xlu1 %v3662_v52, %s2984_s6  ;;  %1982 = vrot.lane.b32.xlu0 %v3655_v25, %s2984_s6  ;;  %s2196_s6 = sadd.s32 %s2963_s29, %s2316_s24  ;;  %s2185_s29 = scalar_lea.sflag [#allocation5], %s285_s14 }
 0x241   : > { %s2317_s11 = sshll.u32 %s2196_s6, 7  ;;  %p2888_p4 = pneg %p2887_p2 }
 0x242   : > { %s3832_s19 = scalar_lea.hbm %s3898_s7, %s2317_s11 }
 0x243   : > { %p2895_p9 = pnand %p2894_p7, %p2888_p4 }
 0x244   : > { %1290 = vperm.xlu0 %2851, %v1259_v46   ;;  %1370 = vperm.xlu1 %2852, %v1260_v40  }
 0x248   : > { %1384 = vperm.xlu1 %2852, %v1261_v43  }
 0x27e   : > { %v2763_v55 = vpop.permute.xlu1 %2762  ;;  %v2753_v12 = vpop.permute.xlu0 %2752 }
 0x27f   : > { %v2755_v49 = vunpack.i.h.bf16 %v2753_v12  ;;  %v2754_v56 = vunpack.i.l.bf16 %v2753_v12  ;;  %v2765_v44 = vunpack.i.h.bf16 %v2763_v55  ;;  %v2764_v26 = vunpack.i.l.bf16 %v2763_v55 }
 0x281   : > { %v2569_v31 = vpack.c.bf16 %v2754_v56, %v3596_v18  ;;  %v2581_v13 = vpack.c.bf16 %v2755_v49, %v3592_v37 }
 0x282   : > { %v2768_v57 = vpop.permute.xlu1 %2767  ;;  %v2758_v48 = vpop.permute.xlu0 %2757 }
 0x283   : > { %v2760_v35 = vunpack.i.h.bf16 %v2758_v48  ;;  %v2759_v61 = vunpack.i.l.bf16 %v2758_v48  ;;  %2570 = vmatpush3.bf16.msra.mxu0 %v2569_v31  ;;  %2582 = vmatpush3.bf16.msra.mxu1 %v2581_v13  ;;  %v2770_v28 = vunpack.i.h.bf16 %v2768_v57  ;;  %v2769_v60 = vunpack.i.l.bf16 %v2768_v57 }
 0x284   : > { %2571 = vmatprep.subr.bf16.mxu0 %v2988_v59  ;;  %2583 = vmatprep.subr.bf16.mxu1 %v2988_v59 }
 0x285   : > { %v2584_v9 = vpack.c.bf16 %v3594_v45, %v2760_v35  ;;  %v2572_v32 = vpack.c.bf16 %v3592_v37, %v2759_v61  ;;  %v2575_v36 = vpack.c.bf16 %v2769_v60, %v2764_v26  ;;  %v2587_v41 = vpack.c.bf16 %v2770_v28, %v2765_v44 }
 0x286   : > { %v2773_v1 = vpop.permute.xlu0 %2772  ;;  %v1286_v33 = vpop.permute.xlu1 %1285 }
 0x287   : > { %2573 = vmatpush3.bf16.msra.mxu0 %v2572_v32  ;;  %2585 = vmatpush3.bf16.msra.mxu1 %v2584_v9  ;;  %v2775_v8 = vunpack.i.h.bf16 %v2773_v1  ;;  %v2774_v2 = vunpack.i.l.bf16 %v2773_v1 }
 0x288   : > { %2574 = vmatprep.subr.bf16.mxu0 %v2988_v59  ;;  %2586 = vmatprep.subr.bf16.mxu1 %v2988_v59 }
 0x289   : > { %v2590_v62 = vpack.c.bf16 %v2775_v8, %v3608_v5  ;;  %v2578_v53 = vpack.c.bf16 %v2774_v2, %v3594_v45 }
 0x28a   : > { %v1423_v30 = vpop.permute.xlu0 %1422  ;;  %v2778_v38 = vpop.permute.xlu1 %2777 }
 0x28b   : > { %2576 = vmatpush3.bf16.msra.mxu0 %v2575_v36  ;;  %2588 = vmatpush3.bf16.msra.mxu1 %v2587_v41  ;;  %v2780_v14 = vunpack.i.h.bf16 %v2778_v38  ;;  %v2779_v58 = vunpack.i.l.bf16 %v2778_v38 }
 0x28c   : > { %2577 = vmatprep.subr.bf16.mxu0 %v2988_v59  ;;  %2589 = vmatprep.subr.bf16.mxu1 %v2988_v59 }
 0x28d   : > { %v2605_v0 = vpack.c.bf16 %v2780_v14, %v3608_v5  ;;  %v2593_v63 = vpack.c.bf16 %v2779_v58, %v3594_v45 }
 0x28e   : > { %v2783_v34 = vpop.permute.xlu0 %2782  ;;  %v2788_v27 = vpop.permute.xlu1 %2787 }
 0x28f   : > { %2579 = vmatpush3.bf16.msra.mxu0 %v2578_v53  ;;  %2591 = vmatpush3.bf16.msra.mxu1 %v2590_v62  ;;  %v2785_v51 = vunpack.i.h.bf16 %v2783_v34  ;;  %v2784_v39 = vunpack.i.l.bf16 %v2783_v34  ;;  %v2790_v19 = vunpack.i.h.bf16 %v2788_v27  ;;  %v2789_v54 = vunpack.i.l.bf16 %v2788_v27 }
 0x290   : > { %2416 = vmatprep.subr.mxu0 %v2990_v11  ;;  %2437 = vmatprep.subr.mxu1 %v2990_v11 }
 0x291   : > { %v2608_v17 = vpack.c.bf16 %v3621_v23, %v2785_v51  ;;  %v2596_v37 = vpack.c.bf16 %v3608_v5, %v2784_v39 }
 0x292   : > { %v2793_v16 = vpop.permute.xlu0 %2792  ;;  %v2798_v20 = vpop.permute.xlu1 %2797 }
 0x293   : > { %2417 = vmatpush3.msra.mxu0 %v1286_v33  ;;  %2438 = vmatpush3.msra.mxu1 %v1423_v30  ;;  %v2795_v45 = vunpack.i.h.bf16 %v2793_v16  ;;  %v2794_v18 = vunpack.i.l.bf16 %v2793_v16  ;;  %v2800_v5 = vunpack.i.h.bf16 %v2798_v20  ;;  %v2799_v42 = vunpack.i.l.bf16 %v2798_v20 }
 0x294   : > { %2419 = vmatmul.mubr.msk.f32.vlgmr.msra.gmra.mrb[0].mxu0 %vm1293_vm4, %v3697_v15  ;;  %2440 = vmatmul.mubr.msk.f32.vlgmr.msra.gmra.mrb[0].mxu1 %vm1293_vm4, %v3697_v15 }
 0x295   : > { %2592 = vmatprep.subr.bf16.mxu0 %v2988_v59  ;;  %2604 = vmatprep.subr.bf16.mxu1 %v2988_v59  ;;  %v2611_v3 = vpack.c.bf16 %v2795_v45, %v2790_v19  ;;  %v2599_v50 = vpack.c.bf16 %v2794_v18, %v2789_v54  ;;  %v2614_v47 = vpack.c.bf16 %v2800_v5, %v3628_v6 }
 0x296   : > { %2594 = vmatpush3.bf16.msra.mxu0 %v2593_v63  ;;  %2606 = vmatpush3.bf16.msra.mxu1 %v2605_v0  ;;  %v1535_v10 = vpop.permute.xlu0 %1534  ;;  %v1647_v7 = vpop.permute.xlu1 %1646  ;;  %v2602_v4 = vpack.c.bf16 %v2799_v42, %v3621_v23 }
 0x297   : > { %2595 = vmatprep.subr.bf16.mxu0 %v2988_v59  ;;  %2607 = vmatprep.subr.bf16.mxu1 %v2988_v59 }
 0x298   : > { %2460 = vmatprep.mubr.msk.f32.mxu0 %vm2989_vm3, %v2990_v11  ;;  %2481 = vmatprep.mubr.msk.f32.mxu1 %vm2989_vm3, %v2990_v11 }
 0x29a   : > { %2597 = vmatpush3.bf16.msra.mxu0 %v2596_v37  ;;  %2609 = vmatpush3.bf16.msra.mxu1 %v2608_v17  ;;  %v2803_v29 = vpop.permute.xlu0 %2802  ;;  %v2808_v46 = vpop.permute.xlu1 %2807 }
 0x29b   : > { %2598 = vmatprep.subr.bf16.mxu0 %v2988_v59  ;;  %2610 = vmatprep.subr.bf16.mxu1 %v2988_v59  ;;  %v2805_v40 = vunpack.i.h.bf16 %v2803_v29  ;;  %v2804_v43 = vunpack.i.l.bf16 %v2803_v29  ;;  %v2810_v12 = vunpack.i.h.bf16 %v2808_v46  ;;  %v2809_v49 = vunpack.i.l.bf16 %v2808_v46 }
 0x29d   : > { %v2629_v56 = vpack.c.bf16 %v2805_v40, %v3628_v6  ;;  %v2617_v31 = vpack.c.bf16 %v2804_v43, %v3621_v23  ;;  %v2632_v57 = vpack.c.bf16 %v3640_v21, %v2810_v12  ;;  %v2620_v48 = vpack.c.bf16 %v3628_v6, %v2809_v49 }
 0x29e   : > { %2600 = vmatpush3.bf16.msra.mxu0 %v2599_v50  ;;  %2612 = vmatpush3.bf16.msra.mxu1 %v2611_v3  ;;  %v2813_v55 = vpop.permute.xlu0 %2812  ;;  %v2818_v13 = vpop.permute.xlu1 %2817 }
 0x29f   : > { %2601 = vmatprep.subr.bf16.mxu0 %v2988_v59  ;;  %2613 = vmatprep.subr.bf16.mxu1 %v2988_v59  ;;  %v2820_v23 = vunpack.i.h.bf16 %v2818_v13  ;;  %v2819_v35 = vunpack.i.l.bf16 %v2818_v13  ;;  %v2815_v61 = vunpack.i.h.bf16 %v2813_v55  ;;  %v2814_v44 = vunpack.i.l.bf16 %v2813_v55 }
 0x2a1   : > { %v2635_v6 = vpack.c.bf16 %v2820_v23, %v2815_v61  ;;  %v2623_v60 = vpack.c.bf16 %v2819_v35, %v2814_v44 }
 0x2a2   : > { %2603 = vmatpush3.bf16.msra.mxu0 %v2602_v4  ;;  %2615 = vmatpush3.bf16.msra.mxu1 %v2614_v47  ;;  %v2823_v26 = vpop.permute.xlu0 %2822  ;;  %v1759_v28 = vpop.permute.xlu1 %1758 }
 0x2a3   : > { %2458 = vmatprep.subr.mxu0 %v2990_v11  ;;  %2479 = vmatprep.subr.mxu1 %v2990_v11  ;;  %v2825_v9 = vunpack.i.h.bf16 %v2823_v26  ;;  %v2824_v32 = vunpack.i.l.bf16 %v2823_v26 }
 0x2a5   : > { %v2638_v33 = vpack.c.bf16 %v2825_v9, %v3646_v24  ;;  %v2626_v8 = vpack.c.bf16 %v2824_v32, %v3640_v21 }
 0x2a6   : > { %2459 = vmatpush3.msra.mxu0 %v1535_v10  ;;  %2480 = vmatpush3.msra.mxu1 %v1647_v7  ;;  %v1871_v1 = vpop.permute.xlu0 %1870  ;;  %v2828_v2 = vpop.permute.xlu1 %2827 }
 0x2a7   : > { %2461 = vmatmul.mubr.msk.f32.vlgmr.msra.gmra.mrb[2].mxu0 %vm1293_vm4, %v3697_v15  ;;  %2482 = vmatmul.mubr.msk.f32.vlgmr.msra.gmra.mrb[2].mxu1 %vm1293_vm4, %v3697_v15  ;;  %v2830_v41 = vunpack.i.h.bf16 %v2828_v2  ;;  %v2829_v30 = vunpack.i.l.bf16 %v2828_v2 }
 0x2a8   : > { %2616 = vmatprep.subr.bf16.mxu0 %v2988_v59  ;;  %2628 = vmatprep.subr.bf16.mxu1 %v2988_v59 }
 0x2a9   : > { %2618 = vmatpush3.bf16.msra.mxu0 %v2617_v31  ;;  %2630 = vmatpush3.bf16.msra.mxu1 %v2629_v56  ;;  %v2653_v53 = vpack.c.bf16 %v2830_v41, %v3646_v24  ;;  %v2641_v38 = vpack.c.bf16 %v2829_v30, %v3640_v21 }
 0x2aa   : > { %2619 = vmatprep.subr.bf16.mxu0 %v2988_v59  ;;  %2631 = vmatprep.subr.bf16.mxu1 %v2988_v59  ;;  %v2833_v36 = vpop.permute.xlu0 %2832  ;;  %v2838_v62 = vpop.permute.xlu1 %2837 }
 0x2ab   : > { %2502 = vmatprep.mubr.msk.f32.mxu0 %vm2989_vm3, %v2990_v11  ;;  %2523 = vmatprep.mubr.msk.f32.mxu1 %vm2989_vm3, %v2990_v11  ;;  %v2835_v14 = vunpack.i.h.bf16 %v2833_v36  ;;  %v2834_v58 = vunpack.i.l.bf16 %v2833_v36  ;;  %v2840_v27 = vunpack.i.h.bf16 %v2838_v62  ;;  %v2839_v0 = vunpack.i.l.bf16 %v2838_v62 }
 0x2ad   : > { %2621 = vmatpush3.bf16.msra.mxu0 %v2620_v48  ;;  %2633 = vmatpush3.bf16.msra.mxu1 %v2632_v57  ;;  %v2656_v63 = vpack.c.bf16 %v3655_v25, %v2835_v14  ;;  %v2644_v21 = vpack.c.bf16 %v3646_v24, %v2834_v58 }
 0x2ae   : > { %2622 = vmatprep.subr.bf16.mxu0 %v2988_v59  ;;  %2634 = vmatprep.subr.bf16.mxu1 %v2988_v59  ;;  %v2843_v34 = vpop.permute.xlu0 %2842  ;;  %v2848_v16 = vpop.permute.xlu1 %2847 }
 0x2af   : > { %v2845_v51 = vunpack.i.h.bf16 %v2843_v34  ;;  %v2844_v39 = vunpack.i.l.bf16 %v2843_v34  ;;  %v2850_v24 = vunpack.i.h.bf16 %v2848_v16  ;;  %v2849_v17 = vunpack.i.l.bf16 %v2848_v16 }
 0x2b1   : > { %2624 = vmatpush3.bf16.msra.mxu0 %v2623_v60  ;;  %2636 = vmatpush3.bf16.msra.mxu1 %v2635_v6  ;;  %v2659_v19 = vpack.c.bf16 %v2845_v51, %v2840_v27  ;;  %v2647_v54 = vpack.c.bf16 %v2844_v39, %v2839_v0  ;;  %v2662_v37 = vpack.c.bf16 %v2850_v24, %v3662_v52 }
 0x2b2   : > { %2625 = vmatprep.subr.bf16.mxu0 %v2988_v59  ;;  %2637 = vmatprep.subr.bf16.mxu1 %v2988_v59  ;;  %v2650_v45 = vpack.c.bf16 %v2849_v17, %v3655_v25  ;;  %v2095_v18 = vpop.permute.xlu1 %2094  ;;  %v1983_v20 = vpop.permute.xlu0 %1982 }
 0x2b5   : > { %2627 = vmatpush3.bf16.msra.mxu0 %v2626_v8  ;;  %2639 = vmatpush3.bf16.msra.mxu1 %v2638_v33 }
 0x2b6   : > { %2500 = vmatprep.subr.mxu0 %v2990_v11  ;;  %2521 = vmatprep.subr.mxu1 %v2990_v11 }
 0x2b9   : > { %2501 = vmatpush3.msra.mxu0 %v1759_v28  ;;  %2522 = vmatpush3.msra.mxu1 %v1871_v1 }
 0x2ba   : > { %2503 = vmatmul.mubr.msk.f32.vlgmr.msra.gmra.mrb[4].mxu0 %vm1293_vm4, %v3697_v15  ;;  %2524 = vmatmul.mubr.msk.f32.vlgmr.msra.gmra.mrb[4].mxu1 %vm1293_vm4, %v3697_v15 }
 0x2bb   : > { %2640 = vmatprep.subr.bf16.mxu0 %v2988_v59  ;;  %2652 = vmatprep.subr.bf16.mxu1 %v2988_v59 }
 0x2bc   : > { %2642 = vmatpush3.bf16.msra.mxu0 %v2641_v38  ;;  %2654 = vmatpush3.bf16.msra.mxu1 %v2653_v53 }
 0x2bd   : > { %2643 = vmatprep.subr.bf16.mxu0 %v2988_v59  ;;  %2655 = vmatprep.subr.bf16.mxu1 %v2988_v59 }
 0x2be   : > { %2544 = vmatprep.mubr.msk.f32.mxu0 %vm2989_vm3, %v2990_v11  ;;  %2565 = vmatprep.mubr.msk.f32.mxu1 %vm2989_vm3, %v2990_v11 }
 0x2c0   : > { %2645 = vmatpush3.bf16.msra.mxu0 %v2644_v21  ;;  %2657 = vmatpush3.bf16.msra.mxu1 %v2656_v63 }
 0x2c1   : > { %2646 = vmatprep.subr.bf16.mxu0 %v2988_v59  ;;  %2658 = vmatprep.subr.bf16.mxu1 %v2988_v59 }
 0x2c3   : > { %v3775_v25 = vpop.permute.xlu0 %1290  ;;  %v3779_v42 = vpop.permute.xlu1 %1370 }
 0x2c4   : > { %2648 = vmatpush3.bf16.msra.mxu0 %v2647_v54  ;;  %2660 = vmatpush3.bf16.msra.mxu1 %v2659_v19 }
 0x2c5   : > { %2649 = vmatprep.subr.bf16.mxu0 %v2988_v59  ;;  %2661 = vmatprep.subr.bf16.mxu1 %v2988_v59 }
 0x2c7   : > { %v1385_v56 = vpop.permute.xlu1 %1384 }
 0x2c8   : > { %2651 = vmatpush3.bf16.msra.mxu0 %v2650_v45  ;;  %2663 = vmatpush3.bf16.msra.mxu1 %v2662_v37  ;;  %v3786_v57 = vrot.slane %v1385_v56, %v3151_v22 }
 0x2c9   : > { %2542 = vmatprep.subr.mxu0 %v2990_v11  ;;  %2563 = vmatprep.subr.mxu1 %v2990_v11 }
 0x2cc   : > { %2543 = vmatpush3.msra.mxu0 %v1983_v20  ;;  %2564 = vmatpush3.msra.mxu1 %v2095_v18 }
 0x2cd   : > { %2545 = vmatmul.mubr.msk.f32.vlgmr.msra.gmra.mrb[6].mxu0 %vm1293_vm4, %v3697_v15  ;;  %2566 = vmatmul.mubr.msk.f32.vlgmr.msra.gmra.mrb[6].mxu1 %vm1293_vm4, %v3697_v15 }
 0x367   : > { %v1363_v52 = vpop.f32.mrb[0].mxu0  ;;  %v1491_v59 = vpop.f32.mrb[0].mxu1 }
 0x368   : > { %v1364_v10 = vadd.f32 %v1363_v52, %v3775_v25  ;;  %v1492_v3 = vadd.f32 %v1491_v59, %v3775_v25  ;;  %v2420_v50 = vpop.f32.mrb[1].mxu0  ;;  %v2441_v5 = vpop.f32.mrb[1].mxu1 }
 0x36a   : > { %v1367_v11 = vmax.f32 %v1364_v10, 0.0  ;;  %v1495_v7 = vmax.f32 %v1492_v3, 0.0 }
 0x36c   : > { %v1373_v47 = vmul.f32 %v3779_v42, %v1367_v11  ;;  %v1496_v4 = vmul.f32 %v1495_v7, %v3779_v42 }
 0x36e   : > { %v1375_v15 = vsel %vm1374_vm5, %v1373_v47, 0.0  ;;  %v1497_v29 = vsel %vm1374_vm5, %v1496_v4, 0.0 }
 0x36f   : > { %v1376_v46 = vrot.slane %v1375_v15, 4  ;;  %v1498_v40 = vrot.slane %v1497_v29, 4 }
 0x371   : > { %v1377_v43 = vadd.f32 %v1376_v46, %v1375_v15  ;;  %v1499_v55 = vadd.f32 %v1498_v40, %v1497_v29 }
 0x373   : > { %v1378_v12 = vrot.slane %v1377_v43, 2  ;;  %v1500_v49 = vrot.slane %v1499_v55, 2 }
 0x375   : > { %v1379_v31 = vadd.f32 %v1378_v12, %v1377_v43  ;;  %v1501_v13 = vadd.f32 %v1500_v49, %v1499_v55 }
 0x377   : > { %v1380_v48 = vrot.slane %v1379_v31, 1  ;;  %v1502_v23 = vrot.slane %v1501_v13, 1 }
 0x379   : > { %v1381_v35 = vadd.f32 %v1380_v48, %v1379_v31  ;;  %v1503_v61 = vadd.f32 %v1502_v23, %v1501_v13 }
 0x37a   : > { %v1603_v44 = vpop.f32.mrb[2].mxu0  ;;  %v1715_v26 = vpop.f32.mrb[2].mxu1 }
 0x37b   : > { %v1391_v28 = vadd.f32 %v3786_v57, %v1381_v35  ;;  %v1504_v6 = vadd.f32 %v1503_v61, %v3786_v57  ;;  %v1604_v60 = vadd.f32 %v1603_v44, %v3775_v25  ;;  %v1716_v9 = vadd.f32 %v1715_v26, %v3775_v25  ;;  %v2462_v32 = vpop.f32.mrb[3].mxu0  ;;  %v2483_v1 = vpop.f32.mrb[3].mxu1 }
 0x37d   : > { %v1607_v33 = vmax.f32 %v1604_v60, 0.0  ;;  %v1719_v8 = vmax.f32 %v1716_v9, 0.0  ;;  %v2300_v22 = vmul.f32 -1.442695, %v1391_v28  ;;  %v2302_v2 = vmul.f32 -1.442695, %v1504_v6 }
 0x37f   : > { %v1608_v36 = vmul.f32 %v1607_v33, %v3779_v42  ;;  %v1720_v41 = vmul.f32 %v1719_v8, %v3779_v42  ;;  %2853 = vpow2.f32 %v2300_v22 }
 0x380   : > { %2855 = vpow2.f32 %v2302_v2 }
 0x381   : > { %v1609_v30 = vsel %vm1374_vm5, %v1608_v36, 0.0  ;;  %v1721_v62 = vsel %vm1374_vm5, %v1720_v41, 0.0 }
 0x382   : > { %v1610_v53 = vrot.slane %v1609_v30, 4  ;;  %v1722_v38 = vrot.slane %v1721_v62, 4 }
 0x384   : > { %v1611_v14 = vadd.f32 %v1610_v53, %v1609_v30  ;;  %v1723_v58 = vadd.f32 %v1722_v38, %v1721_v62 }
 0x386   : > { %v1612_v34 = vrot.slane %v1611_v14, 2  ;;  %v1724_v27 = vrot.slane %v1723_v58, 2 }
 0x388   : > { %v1613_v0 = vadd.f32 %v1612_v34, %v1611_v14  ;;  %v1725_v63 = vadd.f32 %v1724_v27, %v1723_v58 }
 0x389   : > { %v2854_v21 = vpop.eup %2853 }
 0x38a   : > { %v2856_v51 = vpop.eup %2855  ;;  %v1614_v39 = vrot.slane %v1613_v0, 1  ;;  %v1726_v16 = vrot.slane %v1725_v63, 1  ;;  %v1395_v19 = vadd.f32 1.0, %v2854_v21 }
 0x38b   : > { %v1508_v54 = vadd.f32 1.0, %v2856_v51 }
 0x38c   : > { %v1615_v24 = vadd.f32 %v1614_v39, %v1613_v0  ;;  %v1727_v17 = vadd.f32 %v1726_v16, %v1725_v63  ;;  %2857 = vrcp.f32 %v1395_v19 }
 0x38d   : > { %v1827_v37 = vpop.f32.mrb[4].mxu0  ;;  %v1939_v45 = vpop.f32.mrb[4].mxu1  ;;  %2859 = vrcp.f32 %v1508_v54 }
 0x38e   : > { %v1616_v18 = vadd.f32 %v1615_v24, %v3786_v57  ;;  %v1728_v20 = vadd.f32 %v1727_v17, %v3786_v57  ;;  %v1828_v52 = vadd.f32 %v1827_v37, %v3775_v25  ;;  %v1940_v59 = vadd.f32 %v1939_v45, %v3775_v25  ;;  %v2504_v10 = vpop.f32.mrb[5].mxu0  ;;  %v2525_v3 = vpop.f32.mrb[5].mxu1 }
 0x390   : > { %v2304_v50 = vmul.f32 -1.442695, %v1616_v18  ;;  %v2306_v5 = vmul.f32 -1.442695, %v1728_v20  ;;  %v1831_v11 = vmax.f32 %v1828_v52, 0.0  ;;  %v1943_v7 = vmax.f32 %v1940_v59, 0.0 }
 0x392   : > { %2861 = vpow2.f32 %v2304_v50  ;;  %v1832_v47 = vmul.f32 %v1831_v11, %v3779_v42  ;;  %v1944_v4 = vmul.f32 %v1943_v7, %v3779_v42 }
 0x393   : > { %2863 = vpow2.f32 %v2306_v5 }
 0x394   : > { %v1833_v15 = vsel %vm1374_vm5, %v1832_v47, 0.0  ;;  %v1945_v29 = vsel %vm1374_vm5, %v1944_v4, 0.0 }
 0x395   : > { %v1834_v46 = vrot.slane %v1833_v15, 4  ;;  %v1946_v40 = vrot.slane %v1945_v29, 4 }
 0x396   : > { %v2858_v43 = vpop.eup %2857 }
 0x397   : > { %v2860_v55 = vpop.eup %2859  ;;  %v1835_v12 = vadd.f32 %v1834_v46, %v1833_v15  ;;  %v1947_v49 = vadd.f32 %v1946_v40, %v1945_v29  ;;  %1399 = vst.msk [vmem:[%s3586_s17] sm:$0x1] %vm1398_vm6, %v2858_v43 }
 0x398   : > { %1511 = vst.msk [vmem:[%s3586_s17 + $0x1] sm:$0x1] %vm1398_vm6, %v2860_v55 }
 0x399   : > { %v1836_v56 = vrot.slane %v1835_v12, 2  ;;  %v1948_v31 = vrot.slane %v1947_v49, 2 }
 0x39b   : > { %v1837_v13 = vadd.f32 %v1836_v56, %v1835_v12  ;;  %v1949_v48 = vadd.f32 %v1948_v31, %v1947_v49 }
 0x39c   : > { %v2862_v23 = vpop.eup %2861 }
 0x39d   : > { %v2864_v35 = vpop.eup %2863  ;;  %v1620_v61 = vadd.f32 1.0, %v2862_v23  ;;  %v1838_v44 = vrot.slane %v1837_v13, 1  ;;  %v1950_v26 = vrot.slane %v1949_v48, 1 }
 0x39e   : > { %v1732_v28 = vadd.f32 1.0, %v2864_v35 }
 0x39f   : > { %2865 = vrcp.f32 %v1620_v61  ;;  %v1839_v6 = vadd.f32 %v1838_v44, %v1837_v13  ;;  %v1951_v60 = vadd.f32 %v1950_v26, %v1949_v48 }
 0x3a0   : > { %2867 = vrcp.f32 %v1732_v28  ;;  %v2051_v9 = vpop.f32.mrb[6].mxu0  ;;  %v2163_v32 = vpop.f32.mrb[6].mxu1 }
 0x3a1   : > { %v1840_v1 = vadd.f32 %v1839_v6, %v3786_v57  ;;  %v1952_v33 = vadd.f32 %v1951_v60, %v3786_v57  ;;  %v2052_v8 = vadd.f32 %v2051_v9, %v3775_v25  ;;  %v2164_v22 = vadd.f32 %v2163_v32, %v3775_v25  ;;  %v2546_v2 = vpop.f32.mrb[7].mxu0  ;;  %v2567_v36 = vpop.f32.mrb[7].mxu1 }
 0x3a3   : > { %v2308_v41 = vmul.f32 -1.442695, %v1840_v1  ;;  %v2310_v30 = vmul.f32 -1.442695, %v1952_v33  ;;  %v2055_v62 = vmax.f32 %v2052_v8, 0.0  ;;  %v2167_v53 = vmax.f32 %v2164_v22, 0.0 }
 0x3a5   : > { %2869 = vpow2.f32 %v2308_v41  ;;  %v2056_v38 = vmul.f32 %v2055_v62, %v3779_v42  ;;  %v2168_v14 = vmul.f32 %v2167_v53, %v3779_v42 }
 0x3a6   : > { %2871 = vpow2.f32 %v2310_v30 }
 0x3a7   : > { %v2057_v58 = vsel %vm1374_vm5, %v2056_v38, 0.0  ;;  %v2169_v34 = vsel %vm1374_vm5, %v2168_v14, 0.0 }
 0x3a8   : > { %v2058_v27 = vrot.slane %v2057_v58, 4  ;;  %v2170_v25 = vrot.slane %v2169_v34, 4 }
 0x3a9   : > { %v2866_v0 = vpop.eup %2865 }
 0x3aa   : > { %v2868_v63 = vpop.eup %2867  ;;  %1623 = vst.msk [vmem:[%s3586_s17 + $0x2] sm:$0x1] %vm1398_vm6, %v2866_v0  ;;  %v2059_v21 = vadd.f32 %v2058_v27, %v2057_v58  ;;  %v2171_v51 = vadd.f32 %v2170_v25, %v2169_v34 }
 0x3ab   : > { %1735 = vst.msk [vmem:[%s3586_s17 + $0x3] sm:$0x1] %vm1398_vm6, %v2868_v63 }
 0x3ac   : > { %v2060_v39 = vrot.slane %v2059_v21, 2  ;;  %v2172_v16 = vrot.slane %v2171_v51, 2 }
 0x3ae   : > { %v2061_v19 = vadd.f32 %v2060_v39, %v2059_v21  ;;  %v2173_v54 = vadd.f32 %v2172_v16, %v2171_v51 }
 0x3af   : > { %v2870_v42 = vpop.eup %2869 }
 0x3b0   : > { %v2872_v24 = vpop.eup %2871  ;;  %v1844_v17 = vadd.f32 1.0, %v2870_v42  ;;  %v2062_v37 = vrot.slane %v2061_v19, 1  ;;  %v2174_v45 = vrot.slane %v2173_v54, 1 }
 0x3b1   : > { %v1956_v18 = vadd.f32 1.0, %v2872_v24 }
 0x3b2   : > { %2873 = vrcp.f32 %v1844_v17  ;;  %v2063_v20 = vadd.f32 %v2062_v37, %v2061_v19  ;;  %v2175_v52 = vadd.f32 %v2174_v45, %v2173_v54 }
 0x3b3   : > { %2875 = vrcp.f32 %v1956_v18 }
 0x3b4   : > { %v2064_v59 = vadd.f32 %v2063_v20, %v3786_v57  ;;  %v2176_v10 = vadd.f32 %v2175_v52, %v3786_v57 }
 0x3b6   : > { %v2312_v3 = vmul.f32 -1.442695, %v2064_v59  ;;  %v2314_v50 = vmul.f32 -1.442695, %v2176_v10 }
 0x3b8   : > { %2877 = vpow2.f32 %v2312_v3 }
 0x3b9   : > { %2879 = vpow2.f32 %v2314_v50 }
 0x3bc   : > { %v2874_v5 = vpop.eup %2873 }
 0x3bd   : > { %v2876_v11 = vpop.eup %2875  ;;  %1847 = vst.msk [vmem:[%s3586_s17 + $0x4] sm:$0x1] %vm1398_vm6, %v2874_v5 }
 0x3be   : > { %1959 = vst.msk [vmem:[%s3586_s17 + $0x5] sm:$0x1] %vm1398_vm6, %v2876_v11 }
 0x3c2   : > { %v2878_v7 = vpop.eup %2877 }
 0x3c3   : > { %v2880_v47 = vpop.eup %2879  ;;  %v2068_v4 = vadd.f32 1.0, %v2878_v7 }
 0x3c4   : > { %v2180_v15 = vadd.f32 1.0, %v2880_v47 }
 0x3c5   : > { %2881 = vrcp.f32 %v2068_v4 }
 0x3c6   : > { %2883 = vrcp.f32 %v2180_v15 }
 0x3cf   : > { %v2882_v57 = vpop.eup %2881 }
 0x3d0   : > { %v2884_v29 = vpop.eup %2883  ;;  %2071 = vst.msk [vmem:[%s3586_s17 + $0x6] sm:$0x1] %vm1398_vm6, %v2882_v57 }
 0x3d1   : > { %2183 = vst.msk [vmem:[%s3586_s17 + $0x7] sm:$0x1] %vm1398_vm6, %v2884_v29 }
 0x3d2   : > { %2898 = shalt.err (!%p2895_p9)
}
 0x3d3   : > { %s2899_s14 = scalar_lea.hbm %s3832_s19, 128  ;;  %s2903_s6 = scalar_lea.hbm %s3898_s7, 512 }
 0x3d4   : > { %p2900_p10 = scmp.ne.s32.totalorder %s3832_s19, %s2899_s14  ;;  %p2904_p13 = scmp.lt.u32.totalorder %s3832_s19, %s3898_s7 }
 0x3d5   : > { %p2905_p0 = scmp.lt.u32.totalorder %s2903_s6, %s2899_s14  ;;  %p2907_p2 = scmp.lt.u32.totalorder %s2899_s14, %s3832_s19 }
 0x3d6   : > { %p2901_p11 = pnand %p2900_p10, %p3086_p3 }
 0x3d7   : > { %p2906_p1 = por %p2905_p0, %p2904_p13 }
 0x3d8   : > { %p2902_p12 = pneg %p2901_p11 }
 0x3d9   : > { %p2908_p4 = por %p2907_p2, %p2906_p1 }
 0x3db   : > { %p2909_p5 = pnand %p2908_p4, %p2902_p12 }
 0x3dd   : > { %2912 = shalt.err (!%p2909_p5)
}
 0x3de   : > { %2665 = dma.vmem_to_hbm [thread:$0]  (%p3086_p3), %s3834_s25, 128, %s3832_s19, %s2185_s29  }
 0x3df PF: > { %p2671_p6 = scmp.ge.s32.totalorder %s2979_s10, 2  ;;  %s2212_s18 = sand.u32 1, %s2951_s26  }
 0x3e0   : > { %s2213_s30 = scalar_lea.sflag [#allocation5], %s2212_s18 }
 0x3e1   : > { %p2668_p7 = pnand %p2671_p6, %p3095_p8 }
 0x3e3   : > { %2946 = dma.done.wait (!%p2668_p7), %s2213_s30, 128  }
 0x3e4   : > { %2948 = vsyncadd (!%p2668_p7), %s2213_s30, 4294967168  ;;  %s22_s10 = sadd.s32 1, %s2979_s10   ;;  %s3903_s15 = sld [smem:[#allocation7_spill]] }
 0x3e5   : > { %p19_p9 = scmp.ge.s32.totalorder %s22_s10, 6   ;;  %s3904_s26 = smov %s2955_s27 }
 0x3e6   : > { %s3905_s27 = smov %s2959_s28  ;;  %s3906_s28 = smov %s3104_s20 }
 0x3e7   : > { %s3907_s29 = smov %s2971_s8  ;;  %s3908_s30 = smov %s2975_s9 }
 0x3e8   : > { %s3909_s8 = smov %s3912_s12  ;;  %21 = sbr.rel (!%p19_p9) target bundleno = 8 (0x8), region = 104 }
 0x3ea   : > { %s3910_s9 = smov %s3903_s15 }
 0x3ef   :  { %2218 = vsyncpa [#allocation5], 1 }
 0x3f0   :  { %2220 = vsyncpa [#allocation5 + $0x1], 1 }

</bundles_post_ra>
